<compile_context>
chip_gen: v5e
topology: v5e:2x2
jax: 0.10.0
libtpu: 0.0.40
codegen_flags: <defaults>
</compile_context>

<pallas_src>
import jax
import jax.numpy as jnp
from jax.experimental import pallas as pl
from jax.experimental.pallas import tpu as pltpu

# ---------------- configuration (small, consistent with the module) ----------
HID_DIM = 32
N_HEADS = 4
HEAD_DIM = HID_DIM // N_HEADS          # 8
SEQ = 8
BATCH = 2
MAX_REL_POS = 7
SCALE = float(HEAD_DIM) ** 0.5         # sqrt(head_dim) buffer in the module
INV_SCALE = 1.0 / SCALE


# ---------------- Pallas kernel ----------------------------------------------
def _mha_kernel(x_ref, wqkv_ref, bqkv_ref, wo_ref, bo_ref,
                relk_ref, relv_ref, o_ref):
    H = HID_DIM
    x = x_ref[...]                                   # (B*L, 3H)  [q | k | v]

    # Fused Q/K/V projection: single (16,96)@(96,96) MXU push (block-diag W).
    proj = (jnp.dot(x, wqkv_ref[...], preferred_element_type=jnp.float32)
            + bqkv_ref[...])                         # (B*L, 3H)

    qp = proj[:, 0:H]                                # (B*L, H)
    kp = proj[:, H:2 * H]
    vp = proj[:, 2 * H:3 * H]

    # Leading-dim split only (no lane movement).
    q3 = qp.reshape(BATCH, SEQ, H)                   # (B, L, H)
    k3 = kp.reshape(BATCH, SEQ, H)
    v3 = vp.reshape(BATCH, SEQ, H)

    relk = relk_ref[...]                             # (L, L, head_dim)
    relv = relv_ref[...]                             # (L, L, head_dim)

    head_outs = []
    for h in range(N_HEADS):                         # small static loop
        lo = h * HEAD_DIM
        hi = lo + HEAD_DIM
        qh = q3[:, :, lo:hi]                         # (B, L, hd)
        kh = k3[:, :, lo:hi]
        vh = v3[:, :, lo:hi]

        # content-content attention: one batched MXU contraction over B
        attn1 = jnp.einsum('bid,bjd->bij', qh, kh,
                           preferred_element_type=jnp.float32)      # (B, L, L)
        # content-position attention: attn2[b,i,j] = sum_d qh[b,i,d]*relk[i,j,d]
        attn2 = jnp.sum(qh[:, :, None, :] * relk[None, :, :, :], axis=-1)

        attn = (attn1 + attn2) * INV_SCALE

        # numerically stable softmax; divide goes to the EUP via pl.reciprocal
        m = jnp.max(attn, axis=-1, keepdims=True)
        e = jnp.exp(attn - m)
        s = jnp.sum(e, axis=-1, keepdims=True)
        p = e * pl.reciprocal(s, approx=True)                       # (B, L, L)

        # weighted values: one batched MXU contraction over B
        w1 = jnp.einsum('bij,bjd->bid', p, vh,
                        preferred_element_type=jnp.float32)         # (B, L, hd)
        # position-weighted values: w2[b,i,d] = sum_j p[b,i,j]*relv[i,j,d]
        w2 = jnp.sum(p[:, :, :, None] * relv[None, :, :, :], axis=2)

        head_outs.append(w1 + w2)

    xh = jnp.concatenate(head_outs, axis=-1)         # (B, L, H)
    x2 = xh.reshape(BATCH * SEQ, H)                  # leading-dim merge (free)
    out = (jnp.dot(x2, wo_ref[...], preferred_element_type=jnp.float32)
           + bo_ref[...])                            # (B*L, H)
    o_ref[...] = out


def mha_pallas(q_sbh, k_sbh, v_sbh, params):
    """q/k/v: (seq, batch, hid) float32 (batch_first=True convention)."""
    # (seq, b, h) -> (b, seq, h)
    q = jnp.transpose(q_sbh, (1, 0, 2))
    k = jnp.transpose(k_sbh, (1, 0, 2))
    v = jnp.transpose(v_sbh, (1, 0, 2))
    B, L, H = q.shape
    BL = B * L

    # Lane-dense fused input [q | k | v]  -> (B*L, 3H) = (16, 96)
    xcat = jnp.concatenate(
        [q.reshape(BL, H), k.reshape(BL, H), v.reshape(BL, H)], axis=-1)

    # Block-diagonal fused QKV weight (3H, 3H) and fused bias (1, 3H)
    wqkv = jnp.zeros((3 * H, 3 * H), jnp.float32)
    wqkv = wqkv.at[0:H, 0:H].set(params["wq"])
    wqkv = wqkv.at[H:2 * H, H:2 * H].set(params["wk"])
    wqkv = wqkv.at[2 * H:3 * H, 2 * H:3 * H].set(params["wv"])
    bqkv = jnp.concatenate([params["bq"], params["bk"], params["bv"]], axis=-1)

    # relative-position embedding gather (tiny index arithmetic -> plain JAX)
    dist = jnp.arange(L)[None, :] - jnp.arange(L)[:, None]
    idx = jnp.clip(dist, -MAX_REL_POS, MAX_REL_POS) + MAX_REL_POS
    relk = params["rel_k_table"][idx]                # (L, L, head_dim)
    relv = params["rel_v_table"][idx]                # (L, L, head_dim)

    full2d = lambda i: (0, 0)
    full3d = lambda i: (0, 0, 0)

    cost = pl.CostEstimate(flops=365_000, transcendentals=600,
                           bytes_accessed=54_000)

    out = pl.pallas_call(
        _mha_kernel,
        out_shape=jax.ShapeDtypeStruct((BL, H), jnp.float32),
        grid_spec=pltpu.PrefetchScalarGridSpec(
            num_scalar_prefetch=0,
            grid=(1,),                               # single invocation
            in_specs=[
                pl.BlockSpec((BL, 3 * H), full2d),          # [q|k|v] slab
                pl.BlockSpec((3 * H, 3 * H), full2d),       # fused Wqkv
                pl.BlockSpec((1, 3 * H), full2d),           # fused bias
                pl.BlockSpec((H, H), full2d),               # Wo
                pl.BlockSpec((1, H), full2d),               # bo
                pl.BlockSpec((L, L, HEAD_DIM), full3d),     # relK (gathered)
                pl.BlockSpec((L, L, HEAD_DIM), full3d),     # relV (gathered)
            ],
            out_specs=pl.BlockSpec((BL, H), full2d),
        ),
        compiler_params=pltpu.CompilerParams(
            dimension_semantics=("arbitrary",)),
        cost_estimate=cost,
    )(xcat, wqkv, bqkv, params["wo"], params["bo"], relk, relv)

    # (b*seq, h) -> (b, seq, h) -> (seq, b, h)  (module re-applies Rearrange)
    return jnp.transpose(out.reshape(B, L, H), (1, 0, 2))


# ---------------- pure-JAX reference (mirrors the PyTorch forward) ------------
def mha_reference(q_sbh, k_sbh, v_sbh, params):
    q = jnp.transpose(q_sbh, (1, 0, 2))
    k = jnp.transpose(k_sbh, (1, 0, 2))
    v = jnp.transpose(v_sbh, (1, 0, 2))
    B, L, H = q.shape

    qp = q @ params["wq"] + params["bq"][0]
    kp = k @ params["wk"] + params["bk"][0]
    vp = v @ params["wv"] + params["bv"][0]

    rq1 = qp.reshape(B, L, N_HEADS, HEAD_DIM).transpose(0, 2, 1, 3)
    rk1 = kp.reshape(B, L, N_HEADS, HEAD_DIM).transpose(0, 2, 1, 3)
    rv1 = vp.reshape(B, L, N_HEADS, HEAD_DIM).transpose(0, 2, 1, 3)
    attn1 = jnp.einsum('bhqd,bhkd->bhqk', rq1, rk1)

    dist = jnp.arange(L)[None, :] - jnp.arange(L)[:, None]
    idx = jnp.clip(dist, -MAX_REL_POS, MAX_REL_POS) + MAX_REL_POS
    relk = params["rel_k_table"][idx]
    relv = params["rel_v_table"][idx]

    attn2 = jnp.einsum('bhqd,qkd->bhqk', rq1, relk)
    attn = (attn1 + attn2) / SCALE
    attn = jax.nn.softmax(attn, axis=-1)

    w1 = jnp.einsum('bhqk,bhkd->bhqd', attn, rv1)
    w2 = jnp.einsum('bhqk,qkd->bhqd', attn, relv)
    x = (w1 + w2).transpose(0, 2, 1, 3).reshape(B, L, H)
    x = x @ params["wo"] + params["bo"][0]
    return jnp.transpose(x, (1, 0, 2))


# ---------------- deterministic parameter init --------------------------------
def init_params(key):
    ks = jax.random.split(key, 6)
    def xavier(k, shape):
        fan_in, fan_out = shape[0], shape[1]
        bound = (6.0 / (fan_in + fan_out)) ** 0.5
        return jax.random.uniform(k, shape, jnp.float32, -bound, bound)
    return {
        "wq": xavier(ks[0], (HID_DIM, HID_DIM)),
        "bq": jnp.zeros((1, HID_DIM), jnp.float32),
        "wk": xavier(ks[1], (HID_DIM, HID_DIM)),
        "bk": jnp.zeros((1, HID_DIM), jnp.float32),
        "wv": xavier(ks[2], (HID_DIM, HID_DIM)),
        "bv": jnp.zeros((1, HID_DIM), jnp.float32),
        "wo": xavier(ks[3], (HID_DIM, HID_DIM)),
        "bo": jnp.zeros((1, HID_DIM), jnp.float32),
        "rel_k_table": xavier(ks[4], (2 * MAX_REL_POS + 1, HEAD_DIM)),
        "rel_v_table": xavier(ks[5], (2 * MAX_REL_POS + 1, HEAD_DIM)),
    }


if __name__ == "__main__":
    key = jax.random.PRNGKey(0)
    kp, kq, kk, kv = jax.random.split(key, 4)
    params = init_params(kp)

    # inputs are (seq, batch, hid) because batch_first=True applies
    # Rearrange('seq b h -> b seq h') internally
    q = jax.random.normal(kq, (SEQ, BATCH, HID_DIM), jnp.float32)
    k = jax.random.normal(kk, (SEQ, BATCH, HID_DIM), jnp.float32)
    v = jax.random.normal(kv, (SEQ, BATCH, HID_DIM), jnp.float32)

    out = mha_pallas(q, k, v, params)
    out = jax.block_until_ready(out)

    ref = mha_reference(q, k, v, params)
    assert out.shape == (SEQ, BATCH, HID_DIM), out.shape
    # tolerance accounts for the approximate (EUP) softmax reciprocal
    assert jnp.allclose(out, ref, atol=5e-3, rtol=5e-3), float(
        jnp.max(jnp.abs(out - ref)))
    print("KERNEL_OK")
</pallas_src>

<mosaic_0001>
module attributes {stable_mosaic.version = 11 : i64} {
  func.func @_mha_kernel(%arg0: i32, %arg1: memref<16x96xf32, #tpu.memory_space<vmem>>, %arg2: memref<96x96xf32, #tpu.memory_space<vmem>>, %arg3: memref<1x96xf32, #tpu.memory_space<vmem>>, %arg4: memref<32x32xf32, #tpu.memory_space<vmem>>, %arg5: memref<1x32xf32, #tpu.memory_space<vmem>>, %arg6: memref<8x8x8xf32, #tpu.memory_space<vmem>>, %arg7: memref<8x8x8xf32, #tpu.memory_space<vmem>>, %arg8: memref<16x32xf32, #tpu.memory_space<vmem>>) attributes {dimension_semantics = [#tpu.dimension_semantics<arbitrary>], iteration_bounds = array<i64: 1>, scalar_prefetch = 0 : i64, scratch_operands = 0 : i64, tpu.core_type = #tpu.core_type<tc>, window_params = [{pipeline_mode = #tpu.pipeline_mode<synchronous>, transform_indices = @transform_0, window_bounds = array<i64: 16, 96>}, {pipeline_mode = #tpu.pipeline_mode<synchronous>, transform_indices = @transform_1, window_bounds = array<i64: 96, 96>}, {pipeline_mode = #tpu.pipeline_mode<synchronous>, transform_indices = @transform_2, window_bounds = array<i64: 1, 96>}, {pipeline_mode = #tpu.pipeline_mode<synchronous>, transform_indices = @transform_3, window_bounds = array<i64: 32, 32>}, {pipeline_mode = #tpu.pipeline_mode<synchronous>, transform_indices = @transform_4, window_bounds = array<i64: 1, 32>}, {pipeline_mode = #tpu.pipeline_mode<synchronous>, transform_indices = @transform_5, window_bounds = array<i64: 8, 8, 8>}, {pipeline_mode = #tpu.pipeline_mode<synchronous>, transform_indices = @transform_6, window_bounds = array<i64: 8, 8, 8>}, {pipeline_mode = #tpu.pipeline_mode<synchronous>, transform_indices = @transform_7, window_bounds = array<i64: 16, 32>}]} {
    %c0 = arith.constant 0 : index
    %c0_0 = arith.constant 0 : index
    %0 = vector.load %arg1[%c0, %c0_0] : memref<16x96xf32, #tpu.memory_space<vmem>>, vector<16x96xf32>
    %c0_1 = arith.constant 0 : index
    %c0_2 = arith.constant 0 : index
    %1 = vector.load %arg2[%c0_1, %c0_2] : memref<96x96xf32, #tpu.memory_space<vmem>>, vector<96x96xf32>
    %cst = arith.constant dense<0.000000e+00> : vector<16x96xf32>
    %2 = tpu.matmul %0, %1, %cst {dimension_numbers = #tpu.dot_dimension_numbers<[1], [0], [0], [1], [0, 0, 1, 1], [], []>} : vector<16x96xf32>, vector<96x96xf32>, vector<16x96xf32> -> vector<16x96xf32>
    %c0_3 = arith.constant 0 : index
    %c0_4 = arith.constant 0 : index
    %3 = vector.load %arg3[%c0_3, %c0_4] : memref<1x96xf32, #tpu.memory_space<vmem>>, vector<1x96xf32>
    %4 = vector.broadcast %3 : vector<1x96xf32> to vector<16x96xf32>
    %5 = arith.addf %2, %4 : vector<16x96xf32>
    %6 = vector.extract_strided_slice %5 {offsets = [0, 0], sizes = [16, 32], strides = [1, 1]} : vector<16x96xf32> to vector<16x32xf32>
    %7 = vector.extract_strided_slice %5 {offsets = [0, 32], sizes = [16, 32], strides = [1, 1]} : vector<16x96xf32> to vector<16x32xf32>
    %8 = vector.extract_strided_slice %5 {offsets = [0, 64], sizes = [16, 32], strides = [1, 1]} : vector<16x96xf32> to vector<16x32xf32>
    %9 = vector.shape_cast %6 : vector<16x32xf32> to vector<2x8x32xf32>
    %10 = vector.shape_cast %7 : vector<16x32xf32> to vector<2x8x32xf32>
    %11 = vector.shape_cast %8 : vector<16x32xf32> to vector<2x8x32xf32>
    %c0_5 = arith.constant 0 : index
    %c0_6 = arith.constant 0 : index
    %c0_7 = arith.constant 0 : index
    %12 = vector.load %arg6[%c0_5, %c0_6, %c0_7] : memref<8x8x8xf32, #tpu.memory_space<vmem>>, vector<8x8x8xf32>
    %c0_8 = arith.constant 0 : index
    %c0_9 = arith.constant 0 : index
    %c0_10 = arith.constant 0 : index
    %13 = vector.load %arg7[%c0_8, %c0_9, %c0_10] : memref<8x8x8xf32, #tpu.memory_space<vmem>>, vector<8x8x8xf32>
    %14 = vector.extract_strided_slice %9 {offsets = [0, 0, 0], sizes = [2, 8, 8], strides = [1, 1, 1]} : vector<2x8x32xf32> to vector<2x8x8xf32>
    %15 = vector.extract_strided_slice %10 {offsets = [0, 0, 0], sizes = [2, 8, 8], strides = [1, 1, 1]} : vector<2x8x32xf32> to vector<2x8x8xf32>
    %16 = vector.extract_strided_slice %11 {offsets = [0, 0, 0], sizes = [2, 8, 8], strides = [1, 1, 1]} : vector<2x8x32xf32> to vector<2x8x8xf32>
    "tpu.trace_start"() <{level = 10 : i32, message = "bid,bjd->bij"}> : () -> ()
    %cst_11 = arith.constant dense<0.000000e+00> : vector<2x8x8xf32>
    %17 = tpu.matmul %14, %15, %cst_11 {dimension_numbers = #tpu.dot_dimension_numbers<[2], [2], [1], [1], [0, 0, 0, 1, 1, 1], [0], [0]>} : vector<2x8x8xf32>, vector<2x8x8xf32>, vector<2x8x8xf32> -> vector<2x8x8xf32>
    "tpu.trace_stop"() : () -> ()
    %18 = vector.shape_cast %14 : vector<2x8x8xf32> to vector<2x8x1x8xf32>
    %19 = vector.shape_cast %12 : vector<8x8x8xf32> to vector<1x8x8x8xf32>
    %20 = vector.broadcast %18 : vector<2x8x1x8xf32> to vector<2x8x8x8xf32>
    %21 = vector.broadcast %19 : vector<1x8x8x8xf32> to vector<2x8x8x8xf32>
    %22 = arith.mulf %20, %21 : vector<2x8x8x8xf32>
    %cst_12 = arith.constant dense<0.000000e+00> : vector<2x8x8xf32>
    %23 = vector.multi_reduction <add>, %22, %cst_12 [3] : vector<2x8x8x8xf32> to vector<2x8x8xf32>
    %24 = arith.addf %17, %23 : vector<2x8x8xf32>
    %cst_13 = arith.constant 0.353553385 : f32
    %25 = vector.broadcast %cst_13 : f32 to vector<2x8x8xf32>
    %26 = arith.mulf %24, %25 : vector<2x8x8xf32>
    %cst_14 = arith.constant dense<0xFF800000> : vector<2x8xf32>
    %27 = vector.multi_reduction <maximumf>, %26, %cst_14 [2] : vector<2x8x8xf32> to vector<2x8xf32>
    %28 = vector.shape_cast %27 : vector<2x8xf32> to vector<2x8x1xf32>
    %29 = vector.broadcast %28 : vector<2x8x1xf32> to vector<2x8x8xf32>
    %30 = arith.subf %26, %29 : vector<2x8x8xf32>
    %31 = math.exp %30 : vector<2x8x8xf32>
    %cst_15 = arith.constant dense<0.000000e+00> : vector<2x8xf32>
    %32 = vector.multi_reduction <add>, %31, %cst_15 [2] : vector<2x8x8xf32> to vector<2x8xf32>
    %33 = vector.shape_cast %32 : vector<2x8xf32> to vector<2x8x1xf32>
    %34 = tpu.reciprocal %33 {approx = true} : vector<2x8x1xf32> -> vector<2x8x1xf32>
    %35 = vector.broadcast %34 : vector<2x8x1xf32> to vector<2x8x8xf32>
    %36 = arith.mulf %31, %35 : vector<2x8x8xf32>
    "tpu.trace_start"() <{level = 10 : i32, message = "bij,bjd->bid"}> : () -> ()
    %cst_16 = arith.constant dense<0.000000e+00> : vector<2x8x8xf32>
    %37 = tpu.matmul %36, %16, %cst_16 {dimension_numbers = #tpu.dot_dimension_numbers<[2], [1], [1], [2], [0, 0, 0, 1, 1, 2], [0], [0]>} : vector<2x8x8xf32>, vector<2x8x8xf32>, vector<2x8x8xf32> -> vector<2x8x8xf32>
    "tpu.trace_stop"() : () -> ()
    %38 = vector.shape_cast %36 : vector<2x8x8xf32> to vector<2x8x8x1xf32>
    %39 = vector.shape_cast %13 : vector<8x8x8xf32> to vector<1x8x8x8xf32>
    %40 = vector.broadcast %38 : vector<2x8x8x1xf32> to vector<2x8x8x8xf32>
    %41 = vector.broadcast %39 : vector<1x8x8x8xf32> to vector<2x8x8x8xf32>
    %42 = arith.mulf %40, %41 : vector<2x8x8x8xf32>
    %cst_17 = arith.constant dense<0.000000e+00> : vector<2x8x8xf32>
    %43 = vector.multi_reduction <add>, %42, %cst_17 [2] : vector<2x8x8x8xf32> to vector<2x8x8xf32>
    %44 = arith.addf %37, %43 : vector<2x8x8xf32>
    %45 = vector.extract_strided_slice %9 {offsets = [0, 0, 8], sizes = [2, 8, 8], strides = [1, 1, 1]} : vector<2x8x32xf32> to vector<2x8x8xf32>
    %46 = vector.extract_strided_slice %10 {offsets = [0, 0, 8], sizes = [2, 8, 8], strides = [1, 1, 1]} : vector<2x8x32xf32> to vector<2x8x8xf32>
    %47 = vector.extract_strided_slice %11 {offsets = [0, 0, 8], sizes = [2, 8, 8], strides = [1, 1, 1]} : vector<2x8x32xf32> to vector<2x8x8xf32>
    "tpu.trace_start"() <{level = 10 : i32, message = "bid,bjd->bij"}> : () -> ()
    %cst_18 = arith.constant dense<0.000000e+00> : vector<2x8x8xf32>
    %48 = tpu.matmul %45, %46, %cst_18 {dimension_numbers = #tpu.dot_dimension_numbers<[2], [2], [1], [1], [0, 0, 0, 1, 1, 1], [0], [0]>} : vector<2x8x8xf32>, vector<2x8x8xf32>, vector<2x8x8xf32> -> vector<2x8x8xf32>
    "tpu.trace_stop"() : () -> ()
    %49 = vector.shape_cast %45 : vector<2x8x8xf32> to vector<2x8x1x8xf32>
    %50 = vector.shape_cast %12 : vector<8x8x8xf32> to vector<1x8x8x8xf32>
    %51 = vector.broadcast %49 : vector<2x8x1x8xf32> to vector<2x8x8x8xf32>
    %52 = vector.broadcast %50 : vector<1x8x8x8xf32> to vector<2x8x8x8xf32>
    %53 = arith.mulf %51, %52 : vector<2x8x8x8xf32>
    %cst_19 = arith.constant dense<0.000000e+00> : vector<2x8x8xf32>
    %54 = vector.multi_reduction <add>, %53, %cst_19 [3] : vector<2x8x8x8xf32> to vector<2x8x8xf32>
    %55 = arith.addf %48, %54 : vector<2x8x8xf32>
    %cst_20 = arith.constant 0.353553385 : f32
    %56 = vector.broadcast %cst_20 : f32 to vector<2x8x8xf32>
    %57 = arith.mulf %55, %56 : vector<2x8x8xf32>
    %cst_21 = arith.constant dense<0xFF800000> : vector<2x8xf32>
    %58 = vector.multi_reduction <maximumf>, %57, %cst_21 [2] : vector<2x8x8xf32> to vector<2x8xf32>
    %59 = vector.shape_cast %58 : vector<2x8xf32> to vector<2x8x1xf32>
    %60 = vector.broadcast %59 : vector<2x8x1xf32> to vector<2x8x8xf32>
    %61 = arith.subf %57, %60 : vector<2x8x8xf32>
    %62 = math.exp %61 : vector<2x8x8xf32>
    %cst_22 = arith.constant dense<0.000000e+00> : vector<2x8xf32>
    %63 = vector.multi_reduction <add>, %62, %cst_22 [2] : vector<2x8x8xf32> to vector<2x8xf32>
    %64 = vector.shape_cast %63 : vector<2x8xf32> to vector<2x8x1xf32>
    %65 = tpu.reciprocal %64 {approx = true} : vector<2x8x1xf32> -> vector<2x8x1xf32>
    %66 = vector.broadcast %65 : vector<2x8x1xf32> to vector<2x8x8xf32>
    %67 = arith.mulf %62, %66 : vector<2x8x8xf32>
    "tpu.trace_start"() <{level = 10 : i32, message = "bij,bjd->bid"}> : () -> ()
    %cst_23 = arith.constant dense<0.000000e+00> : vector<2x8x8xf32>
    %68 = tpu.matmul %67, %47, %cst_23 {dimension_numbers = #tpu.dot_dimension_numbers<[2], [1], [1], [2], [0, 0, 0, 1, 1, 2], [0], [0]>} : vector<2x8x8xf32>, vector<2x8x8xf32>, vector<2x8x8xf32> -> vector<2x8x8xf32>
    "tpu.trace_stop"() : () -> ()
    %69 = vector.shape_cast %67 : vector<2x8x8xf32> to vector<2x8x8x1xf32>
    %70 = vector.shape_cast %13 : vector<8x8x8xf32> to vector<1x8x8x8xf32>
    %71 = vector.broadcast %69 : vector<2x8x8x1xf32> to vector<2x8x8x8xf32>
    %72 = vector.broadcast %70 : vector<1x8x8x8xf32> to vector<2x8x8x8xf32>
    %73 = arith.mulf %71, %72 : vector<2x8x8x8xf32>
    %cst_24 = arith.constant dense<0.000000e+00> : vector<2x8x8xf32>
    %74 = vector.multi_reduction <add>, %73, %cst_24 [2] : vector<2x8x8x8xf32> to vector<2x8x8xf32>
    %75 = arith.addf %68, %74 : vector<2x8x8xf32>
    %76 = vector.extract_strided_slice %9 {offsets = [0, 0, 16], sizes = [2, 8, 8], strides = [1, 1, 1]} : vector<2x8x32xf32> to vector<2x8x8xf32>
    %77 = vector.extract_strided_slice %10 {offsets = [0, 0, 16], sizes = [2, 8, 8], strides = [1, 1, 1]} : vector<2x8x32xf32> to vector<2x8x8xf32>
    %78 = vector.extract_strided_slice %11 {offsets = [0, 0, 16], sizes = [2, 8, 8], strides = [1, 1, 1]} : vector<2x8x32xf32> to vector<2x8x8xf32>
    "tpu.trace_start"() <{level = 10 : i32, message = "bid,bjd->bij"}> : () -> ()
    %cst_25 = arith.constant dense<0.000000e+00> : vector<2x8x8xf32>
    %79 = tpu.matmul %76, %77, %cst_25 {dimension_numbers = #tpu.dot_dimension_numbers<[2], [2], [1], [1], [0, 0, 0, 1, 1, 1], [0], [0]>} : vector<2x8x8xf32>, vector<2x8x8xf32>, vector<2x8x8xf32> -> vector<2x8x8xf32>
    "tpu.trace_stop"() : () -> ()
    %80 = vector.shape_cast %76 : vector<2x8x8xf32> to vector<2x8x1x8xf32>
    %81 = vector.shape_cast %12 : vector<8x8x8xf32> to vector<1x8x8x8xf32>
    %82 = vector.broadcast %80 : vector<2x8x1x8xf32> to vector<2x8x8x8xf32>
    %83 = vector.broadcast %81 : vector<1x8x8x8xf32> to vector<2x8x8x8xf32>
    %84 = arith.mulf %82, %83 : vector<2x8x8x8xf32>
    %cst_26 = arith.constant dense<0.000000e+00> : vector<2x8x8xf32>
    %85 = vector.multi_reduction <add>, %84, %cst_26 [3] : vector<2x8x8x8xf32> to vector<2x8x8xf32>
    %86 = arith.addf %79, %85 : vector<2x8x8xf32>
    %cst_27 = arith.constant 0.353553385 : f32
    %87 = vector.broadcast %cst_27 : f32 to vector<2x8x8xf32>
    %88 = arith.mulf %86, %87 : vector<2x8x8xf32>
    %cst_28 = arith.constant dense<0xFF800000> : vector<2x8xf32>
    %89 = vector.multi_reduction <maximumf>, %88, %cst_28 [2] : vector<2x8x8xf32> to vector<2x8xf32>
    %90 = vector.shape_cast %89 : vector<2x8xf32> to vector<2x8x1xf32>
    %91 = vector.broadcast %90 : vector<2x8x1xf32> to vector<2x8x8xf32>
    %92 = arith.subf %88, %91 : vector<2x8x8xf32>
    %93 = math.exp %92 : vector<2x8x8xf32>
    %cst_29 = arith.constant dense<0.000000e+00> : vector<2x8xf32>
    %94 = vector.multi_reduction <add>, %93, %cst_29 [2] : vector<2x8x8xf32> to vector<2x8xf32>
    %95 = vector.shape_cast %94 : vector<2x8xf32> to vector<2x8x1xf32>
    %96 = tpu.reciprocal %95 {approx = true} : vector<2x8x1xf32> -> vector<2x8x1xf32>
    %97 = vector.broadcast %96 : vector<2x8x1xf32> to vector<2x8x8xf32>
    %98 = arith.mulf %93, %97 : vector<2x8x8xf32>
    "tpu.trace_start"() <{level = 10 : i32, message = "bij,bjd->bid"}> : () -> ()
    %cst_30 = arith.constant dense<0.000000e+00> : vector<2x8x8xf32>
    %99 = tpu.matmul %98, %78, %cst_30 {dimension_numbers = #tpu.dot_dimension_numbers<[2], [1], [1], [2], [0, 0, 0, 1, 1, 2], [0], [0]>} : vector<2x8x8xf32>, vector<2x8x8xf32>, vector<2x8x8xf32> -> vector<2x8x8xf32>
    "tpu.trace_stop"() : () -> ()
    %100 = vector.shape_cast %98 : vector<2x8x8xf32> to vector<2x8x8x1xf32>
    %101 = vector.shape_cast %13 : vector<8x8x8xf32> to vector<1x8x8x8xf32>
    %102 = vector.broadcast %100 : vector<2x8x8x1xf32> to vector<2x8x8x8xf32>
    %103 = vector.broadcast %101 : vector<1x8x8x8xf32> to vector<2x8x8x8xf32>
    %104 = arith.mulf %102, %103 : vector<2x8x8x8xf32>
    %cst_31 = arith.constant dense<0.000000e+00> : vector<2x8x8xf32>
    %105 = vector.multi_reduction <add>, %104, %cst_31 [2] : vector<2x8x8x8xf32> to vector<2x8x8xf32>
    %106 = arith.addf %99, %105 : vector<2x8x8xf32>
    %107 = vector.extract_strided_slice %9 {offsets = [0, 0, 24], sizes = [2, 8, 8], strides = [1, 1, 1]} : vector<2x8x32xf32> to vector<2x8x8xf32>
    %108 = vector.extract_strided_slice %10 {offsets = [0, 0, 24], sizes = [2, 8, 8], strides = [1, 1, 1]} : vector<2x8x32xf32> to vector<2x8x8xf32>
    %109 = vector.extract_strided_slice %11 {offsets = [0, 0, 24], sizes = [2, 8, 8], strides = [1, 1, 1]} : vector<2x8x32xf32> to vector<2x8x8xf32>
    "tpu.trace_start"() <{level = 10 : i32, message = "bid,bjd->bij"}> : () -> ()
    %cst_32 = arith.constant dense<0.000000e+00> : vector<2x8x8xf32>
    %110 = tpu.matmul %107, %108, %cst_32 {dimension_numbers = #tpu.dot_dimension_numbers<[2], [2], [1], [1], [0, 0, 0, 1, 1, 1], [0], [0]>} : vector<2x8x8xf32>, vector<2x8x8xf32>, vector<2x8x8xf32> -> vector<2x8x8xf32>
    "tpu.trace_stop"() : () -> ()
    %111 = vector.shape_cast %107 : vector<2x8x8xf32> to vector<2x8x1x8xf32>
    %112 = vector.shape_cast %12 : vector<8x8x8xf32> to vector<1x8x8x8xf32>
    %113 = vector.broadcast %111 : vector<2x8x1x8xf32> to vector<2x8x8x8xf32>
    %114 = vector.broadcast %112 : vector<1x8x8x8xf32> to vector<2x8x8x8xf32>
    %115 = arith.mulf %113, %114 : vector<2x8x8x8xf32>
    %cst_33 = arith.constant dense<0.000000e+00> : vector<2x8x8xf32>
    %116 = vector.multi_reduction <add>, %115, %cst_33 [3] : vector<2x8x8x8xf32> to vector<2x8x8xf32>
    %117 = arith.addf %110, %116 : vector<2x8x8xf32>
    %cst_34 = arith.constant 0.353553385 : f32
    %118 = vector.broadcast %cst_34 : f32 to vector<2x8x8xf32>
    %119 = arith.mulf %117, %118 : vector<2x8x8xf32>
    %cst_35 = arith.constant dense<0xFF800000> : vector<2x8xf32>
    %120 = vector.multi_reduction <maximumf>, %119, %cst_35 [2] : vector<2x8x8xf32> to vector<2x8xf32>
    %121 = vector.shape_cast %120 : vector<2x8xf32> to vector<2x8x1xf32>
    %122 = vector.broadcast %121 : vector<2x8x1xf32> to vector<2x8x8xf32>
    %123 = arith.subf %119, %122 : vector<2x8x8xf32>
    %124 = math.exp %123 : vector<2x8x8xf32>
    %cst_36 = arith.constant dense<0.000000e+00> : vector<2x8xf32>
    %125 = vector.multi_reduction <add>, %124, %cst_36 [2] : vector<2x8x8xf32> to vector<2x8xf32>
    %126 = vector.shape_cast %125 : vector<2x8xf32> to vector<2x8x1xf32>
    %127 = tpu.reciprocal %126 {approx = true} : vector<2x8x1xf32> -> vector<2x8x1xf32>
    %128 = vector.broadcast %127 : vector<2x8x1xf32> to vector<2x8x8xf32>
    %129 = arith.mulf %124, %128 : vector<2x8x8xf32>
    "tpu.trace_start"() <{level = 10 : i32, message = "bij,bjd->bid"}> : () -> ()
    %cst_37 = arith.constant dense<0.000000e+00> : vector<2x8x8xf32>
    %130 = tpu.matmul %129, %109, %cst_37 {dimension_numbers = #tpu.dot_dimension_numbers<[2], [1], [1], [2], [0, 0, 0, 1, 1, 2], [0], [0]>} : vector<2x8x8xf32>, vector<2x8x8xf32>, vector<2x8x8xf32> -> vector<2x8x8xf32>
    "tpu.trace_stop"() : () -> ()
    %131 = vector.shape_cast %129 : vector<2x8x8xf32> to vector<2x8x8x1xf32>
    %132 = vector.shape_cast %13 : vector<8x8x8xf32> to vector<1x8x8x8xf32>
    %133 = vector.broadcast %131 : vector<2x8x8x1xf32> to vector<2x8x8x8xf32>
    %134 = vector.broadcast %132 : vector<1x8x8x8xf32> to vector<2x8x8x8xf32>
    %135 = arith.mulf %133, %134 : vector<2x8x8x8xf32>
    %cst_38 = arith.constant dense<0.000000e+00> : vector<2x8x8xf32>
    %136 = vector.multi_reduction <add>, %135, %cst_38 [2] : vector<2x8x8x8xf32> to vector<2x8x8xf32>
    %137 = arith.addf %130, %136 : vector<2x8x8xf32>
    %138 = tpu.concatenate %44, %75, %106, %137 in 2 : vector<2x8x8xf32>, vector<2x8x8xf32>, vector<2x8x8xf32>, vector<2x8x8xf32> -> vector<2x8x32xf32>
    %139 = vector.shape_cast %138 : vector<2x8x32xf32> to vector<16x32xf32>
    %c0_39 = arith.constant 0 : index
    %c0_40 = arith.constant 0 : index
    %140 = vector.load %arg4[%c0_39, %c0_40] : memref<32x32xf32, #tpu.memory_space<vmem>>, vector<32x32xf32>
    %cst_41 = arith.constant dense<0.000000e+00> : vector<16x32xf32>
    %141 = tpu.matmul %139, %140, %cst_41 {dimension_numbers = #tpu.dot_dimension_numbers<[1], [0], [0], [1], [0, 0, 1, 1], [], []>} : vector<16x32xf32>, vector<32x32xf32>, vector<16x32xf32> -> vector<16x32xf32>
    %c0_42 = arith.constant 0 : index
    %c0_43 = arith.constant 0 : index
    %142 = vector.load %arg5[%c0_42, %c0_43] : memref<1x32xf32, #tpu.memory_space<vmem>>, vector<1x32xf32>
    %143 = vector.broadcast %142 : vector<1x32xf32> to vector<16x32xf32>
    %144 = arith.addf %141, %143 : vector<16x32xf32>
    %c0_44 = arith.constant 0 : index
    %c0_45 = arith.constant 0 : index
    %145 = vector.load %arg8[%c0_44, %c0_45] : memref<16x32xf32, #tpu.memory_space<vmem>>, vector<16x32xf32>
    tpu.vector_store %arg8[%c0_44, %c0_45], %144 {strides = array<i32>} : memref<16x32xf32, #tpu.memory_space<vmem>>, vector<16x32xf32>,
    return
  }
  func.func @transform_0(%arg0: i32) -> (i32, i32) {
    %c0_i32 = arith.constant 0 : i32
    %c0_i32_0 = arith.constant 0 : i32
    %c0_i32_1 = arith.constant 0 : i32
    return %c0_i32, %c0_i32_0 : i32, i32
  }
  func.func @transform_1(%arg0: i32) -> (i32, i32) {
    %c0_i32 = arith.constant 0 : i32
    %c0_i32_0 = arith.constant 0 : i32
    %c0_i32_1 = arith.constant 0 : i32
    return %c0_i32, %c0_i32_0 : i32, i32
  }
  func.func @transform_2(%arg0: i32) -> (i32, i32) {
    %c0_i32 = arith.constant 0 : i32
    %c0_i32_0 = arith.constant 0 : i32
    %c0_i32_1 = arith.constant 0 : i32
    return %c0_i32, %c0_i32_0 : i32, i32
  }
  func.func @transform_3(%arg0: i32) -> (i32, i32) {
    %c0_i32 = arith.constant 0 : i32
    %c0_i32_0 = arith.constant 0 : i32
    %c0_i32_1 = arith.constant 0 : i32
    return %c0_i32, %c0_i32_0 : i32, i32
  }
  func.func @transform_4(%arg0: i32) -> (i32, i32) {
    %c0_i32 = arith.constant 0 : i32
    %c0_i32_0 = arith.constant 0 : i32
    %c0_i32_1 = arith.constant 0 : i32
    return %c0_i32, %c0_i32_0 : i32, i32
  }
  func.func @transform_5(%arg0: i32) -> (i32, i32, i32) {
    %c0_i32 = arith.constant 0 : i32
    %c0_i32_0 = arith.constant 0 : i32
    %c0_i32_1 = arith.constant 0 : i32
    %c0_i32_2 = arith.constant 0 : i32
    return %c0_i32, %c0_i32_0, %c0_i32_1 : i32, i32, i32
  }
  func.func @transform_6(%arg0: i32) -> (i32, i32, i32) {
    %c0_i32 = arith.constant 0 : i32
    %c0_i32_0 = arith.constant 0 : i32
    %c0_i32_1 = arith.constant 0 : i32
    %c0_i32_2 = arith.constant 0 : i32
    return %c0_i32, %c0_i32_0, %c0_i32_1 : i32, i32, i32
  }
  func.func @transform_7(%arg0: i32) -> (i32, i32) {
    %c0_i32 = arith.constant 0 : i32
    %c0_i32_0 = arith.constant 0 : i32
    %c0_i32_1 = arith.constant 0 : i32
    return %c0_i32, %c0_i32_0 : i32, i32
  }
}

</mosaic_0001>

<bundles_post_ra>
// kernel: tpu_custom_call.1
= control target key start
LH: loop header
LB: loop body
LE: loop exit
PB: predicated region body
PF: predicated region fallthrough
CT: control target
= control target key end

     0   :  { %12 = vsyncpa [#allocation3], 0  ;;  %s4193_s0 = inlined_call_operand.hbm [shape: f32[16,96], index: 0, kind: input, shape index: {}]   ;;  %s4194_s1 = inlined_call_operand.hbm [shape: f32[96,96], index: 1, kind: input, shape index: {}]   ;;  %s4195_s2 = inlined_call_operand.vmem [shape: f32[1,96], index: 2, kind: input, shape index: {}]   ;;  %s4196_s3 = inlined_call_operand.hbm [shape: f32[32,32], index: 3, kind: input, shape index: {}]   ;;  %s4197_s4 = inlined_call_operand.vmem [shape: f32[1,32], index: 4, kind: input, shape index: {}]   ;;  %s4198_s5 = inlined_call_operand.hbm [shape: f32[8,8,8], index: 5, kind: input, shape index: {}]   ;;  %s4199_s6 = inlined_call_operand.hbm [shape: f32[8,8,8], index: 6, kind: input, shape index: {}]   ;;  %s4200_s7 = inlined_call_operand.hbm [shape: f32[16,32], index: 7, kind: output, shape index: {}]  }
   0x1   :  { %13 = vsyncpa [#allocation6], 0 }
   0x2   :  { %14 = vsyncpa [#allocation9], 0 }
   0x3   :  { %15 = vsyncpa [#allocation4], 0  ;;  %s33_s26 = sshll.u32 %s4194_s1, 4  ;;  %s2913_s27 = smov [#allocation5]   ;;  %s34_s26 = int_to_ptr.hbm [resolvable:$true] %s33_s26 }
   0x4   :  { %s35_s28 = sshll.u32 %s2913_s27, 4  ;;  %s63_s8 = sshll.u32 %s4198_s5, 4  ;;  %s36_s28 = int_to_ptr.vmem [resolvable:$true] %s35_s28  ;;  %s64_s8 = int_to_ptr.hbm [resolvable:$true] %s63_s8 }
   0x5   :  { %s2914_s9 = smov 128   ;;  %s2915_s10 = smov 8  }
   0x6   :  { %41 = dma.hbm_to_vmem [thread:$0]  %s34_s26, 1536, %s36_s28, [#allocation6], %s2914_s9, %s2914_s9, %s2915_s10  }
   0x7   :  { %s2916_s11 = smov [#allocation8]   ;;  %s20_s1 = sshll.u32 %s4193_s0, 4  ;;  %s21_s1 = int_to_ptr.hbm [resolvable:$true] %s20_s1 }
   0x8   :  { %s65_s12 = sshll.u32 %s2916_s11, 4  ;;  %s48_s16 = sshll.u32 %s4196_s3, 4  ;;  %s66_s12 = int_to_ptr.vmem [resolvable:$true] %s65_s12  ;;  %s49_s16 = int_to_ptr.hbm [resolvable:$true] %s48_s16 }
   0x9   :  { %71 = dma.hbm_to_vmem [thread:$0]  %s64_s8, 1024, %s66_s12, [#allocation9], %s2914_s9, %s2914_s9, %s2915_s10  }
   0xa   :  { %s2917_s17 = smov [#allocation2]   ;;  %s2918_s19 = smov [#allocation7]  }
   0xb   :  { %s22_s18 = sshll.u32 %s2917_s17, 4  ;;  %s50_s0 = sshll.u32 %s2918_s19, 4  ;;  %s23_s18 = int_to_ptr.vmem [resolvable:$true] %s22_s18  ;;  %s51_s0 = int_to_ptr.vmem [resolvable:$true] %s50_s0 }
   0xc   :  { %28 = dma.hbm_to_vmem [thread:$0]  %s21_s1, 256, %s23_s18, [#allocation3], %s2914_s9, %s2914_s9, %s2915_s10  }
   0xd   :  { %s76_s22 = sshll.u32 %s4199_s6, 4  ;;  %s2919_s3 = smov [#allocation10]   ;;  %s77_s22 = int_to_ptr.hbm [resolvable:$true] %s76_s22 }
   0xe   :  { %56 = dma.hbm_to_vmem [thread:$0]  %s49_s16, 512, %s51_s0, [#allocation6], %s2914_s9, %s2914_s9, %s2915_s10  }
   0xf   :  { %s78_s23 = sshll.u32 %s2919_s3, 4  ;;  %s79_s23 = int_to_ptr.vmem [resolvable:$true] %s78_s23 }
  0x10   :  { %84 = dma.hbm_to_vmem [thread:$0]  %s77_s22, 1024, %s79_s23, [#allocation9], %s2914_s9, %s2914_s9, %s2915_s10  }
  0x11   :  { %2905 = dma.done.wait [#allocation3], 256  }
  0x12   :  { %2906 = vsyncadd [#allocation3], 4294967040 }
  0x13   :  { %2907 = dma.done.wait [#allocation6], 2048  }
  0x14   :  { %2908 = vsyncadd [#allocation6], 4294965248 }
  0x15   :  { %2909 = dma.done.wait [#allocation9], 2048  }
  0x16   :  { %2910 = vsyncadd [#allocation9], 4294965248  ;;  %v118_v0 = vld [vmem:[#allocation5 + $0x58] sm:$0xff]  ;;  %v117_v1 = vld [vmem:[#allocation5 + $0x50] sm:$0xff]  ;;  %s2920_s6 = smov 16   ;;  %vm123_vm0 = vcmask 785408  }
  0x17   :  { %134 = vmatpush.msra.mxu0 %v118_v0  ;;  %v3004_v2 = vld [vmem:[#allocation8 + $0x18] sm:$0xff]  ;;  %v3006_v3 = vld [vmem:[#allocation8 + $0x10] sm:$0xff]  ;;  %v116_v4 = vld [vmem:[#allocation5 + $0x48] sm:$0xff]  ;;  %s2921_s26 = smov 112   ;;  %s2922_s27 = smov 88   ;;  %vm233_vm1 = vcmask 64512  }
  0x18   :  { %753 = vrot.lane.b32.xlu0 %v3004_v2, %s2915_s10  ;;  %751 = vrot.lane.b32.xlu1 %v3006_v3, %s2915_s10  ;;  %v115_v5 = vld [vmem:[#allocation5 + $0x40] sm:$0xff]  ;;  %v114_v6 = vld [vmem:[#allocation5 + $0x38] sm:$0xff]  ;;  %v3012_v7 = vld [vmem:[#allocation8 + $0x28] sm:$0xff]  ;;  %s2924_s28 = smov 120   ;;  %s2925_s29 = smov 80   ;;  %vm302_vm2 = vcmask 1041409  }
  0x19   :  { %135 = vmatpush.msra.mxu0 %v117_v1  ;;  %v3014_v8 = vld [vmem:[#allocation8] sm:$0xff]  ;;  %v113_v10 = vld [vmem:[#allocation5 + $0x30] sm:$0xff]  ;;  %v112_v11 = vld [vmem:[#allocation5 + $0x28] sm:$0xff]  ;;  %s2926_s30 = smov 64   ;;  %vm304_vm3 = vcmask 1042434   ;;  %vm306_vm4 = vcmask 1043459  }
  0x1a   :  { %v3016_v9 = vld [vmem:[#allocation8 + $0x20] sm:$0xff]  ;;  %747 = vrot.lane.b32.xlu2 %v3014_v8, %s2915_s10  ;;  %v3024_v13 = vld [vmem:[#allocation8 + $0x8] sm:$0xff]  ;;  %v110_v14 = vld [vmem:[#allocation5 + $0x18] sm:$0xff]  ;;  %vm308_vm5 = vcmask 1044484   ;;  %vm310_vm6 = vcmask 1045509   ;;  %vm312_vm7 = vcmask 1046534  }
  0x1b   :  { %136 = vmatpush.msra.mxu0 %v116_v4  ;;  %v111_v12 = vld [vmem:[#allocation5 + $0x20] sm:$0xff]  ;;  %v3026_v15 = vld [vmem:[#allocation8 + $0x38] sm:$0xff]  ;;  %v109_v16 = vld [vmem:[#allocation5 + $0x10] sm:$0xff]  ;;  %vm314_vm8 = vcmask 1047559   ;;  %s2927_s8 = smov 104   ;;  %s2928_s11 = smov 72  }
  0x1c   :  { %v108_v17 = vld [vmem:[#allocation5 + $0x8] sm:$0xff]  ;;  %v107_v18 = vld [vmem:[#allocation5] sm:$0xff]  ;;  %v3034_v19 = vld [vmem:[#allocation8 + $0x30] sm:$0xff]  ;;  %s2929_s12 = smov 24   ;;  %s2930_s13 = smov 56   ;;  %vm2585_vm9 = vcmask 130048  }
  0x1d   :  { %137 = vmatpush.msra.mxu0 %v115_v5  ;;  %v105_v20 = vld [vmem:[#allocation2] sm:$0xff]  ;;  %v106_v21 = vld [vmem:[#allocation2 + $0x8] sm:$0xff]  ;;  %s2931_s14 = smov 48   ;;  %s2932_s1 = smov 40   ;;  %vm2588_vm10 = vcmask 195584   ;;  %vm2599_vm11 = vcmask 261120  }
  0x1e   :  { %v3055_v22 = vld [vmem:[%s4195_s2] ss:$0 sm:$0xff]  ;;  %s2923_s2 = smov 96   ;;  %s2933_s16 = smov [#allocation11]  }
  0x1f   :  { %138 = vmatpush.msra.mxu0 %v114_v6  ;;  %s2635_s17 = sshll.u32 %s2933_s16, 4  ;;  %s2637_s0 = sshll.u32 %s4200_s7, 4  ;;  %s2636_s17 = int_to_ptr.vmem [resolvable:$true] %s2635_s17  ;;  %s2638_s0 = int_to_ptr.hbm [resolvable:$true] %s2637_s0 }
  0x20   :  { %757 = vrot.lane.b32.xlu0 %v3012_v7, %s2915_s10  ;;  %755 = vrot.lane.b32.xlu1 %v3016_v9, %s2915_s10 }
  0x21   :  { %139 = vmatpush.msra.mxu0 %v113_v10 }
  0x22   :  { %749 = vrot.lane.b32.xlu2 %v3024_v13, %s2915_s10 }
  0x23   :  { %140 = vmatpush.msra.mxu0 %v112_v11 }
  0x25   :  { %141 = vmatpush.msra.mxu0 %v111_v12 }
  0x27   :  { %142 = vmatpush.msra.mxu0 %v110_v14 }
  0x28   :  { %761 = vrot.lane.b32.xlu1 %v3026_v15, %s2915_s10  ;;  %1351 = vrot.lane.b32.xlu0 %v3014_v8, %s2920_s6 }
  0x29   :  { %143 = vmatpush.msra.mxu0 %v109_v16 }
  0x2a   :  { %759 = vrot.lane.b32.xlu2 %v3034_v19, %s2915_s10 }
  0x2b   :  { %144 = vmatpush.msra.mxu0 %v108_v17 }
  0x2d   :  { %145 = vmatpush.msra.mxu0 %v107_v18 }
  0x2e   :  { %2652 = vmatmul.msk.f32.vlgmr.msra.gmra.mxu0 %vm123_vm0, %v105_v20 }
  0x30   :  { %1355 = vrot.lane.b32.xlu1 %v3006_v3, %s2920_s6  ;;  %1357 = vrot.lane.b32.xlu0 %v3004_v2, %s2920_s6 }
  0x32   :  { %1353 = vrot.lane.b32.xlu2 %v3024_v13, %s2920_s6 }
  0x36   :  { %2653 = vmatmul.msk.f32.gmra.mxu0 %vm123_vm0, %v106_v21 }
  0x38   :  { %1361 = vrot.lane.b32.xlu1 %v3012_v7, %s2920_s6  ;;  %1363 = vrot.lane.b32.xlu0 %v3034_v19, %s2920_s6 }
  0x3a   :  { %1359 = vrot.lane.b32.xlu2 %v3016_v9, %s2920_s6 }
  0x42   :  { %1365 = vrot.lane.b32.xlu2 %v3026_v15, %s2920_s6 }
  0x74   :  { %v3057_v23 = vpop.permute.xlu2 %747 }
  0x7c   :  { %v3078_v32 = vpop.permute.xlu2 %749 }
  0x84   :  { %v3155_v12 = vpop.permute.xlu2 %759 }
  0x8a   :  { %v3067_v27 = vpop.permute.xlu1 %751  ;;  %v3074_v30 = vpop.permute.xlu0 %753 }
  0x92   :  { %v3094_v39 = vpop.permute.xlu1 %755  ;;  %v3096_v40 = vpop.permute.xlu0 %757 }
  0x9a   :  { %v3112_v46 = vpop.permute.xlu1 %761  ;;  %v3152_v11 = vpop.permute.xlu0 %1351 }
  0xa2   :  { %v3160_v17 = vpop.permute.xlu0 %1357 }
  0xab   :  { %v147_v24 = vpop.f32.mrf.mxu0 }
  0xac   :  { %v3060_v25 = vadd.f32 %v3055_v22, %v147_v24 }
  0xae   :  { %1503 = vrot.lane.b32.xlu2 %v3060_v25, %s2921_s26  ;;  %901 = vrot.lane.b32.xlu1 %v3060_v25, %s2922_s27  ;;  %v172_v26 = vrot.slane %v3060_v25, 2  ;;  %v171_v28 = vrot.slane %v3060_v25, 1  ;;  %v175_v33 = vrot.slane %v3060_v25, 5  ;;  %v174_v36 = vrot.slane %v3060_v25, 4 }
  0xaf   :  { %282 = vrot.lane.b32.xlu0 %v3060_v25, %s2923_s2  ;;  %v177_v41 = vrot.slane %v3060_v25, 7  ;;  %v3110_v45 = vperm.slane %v3060_v25, 0  ;;  %v173_v49 = vrot.slane %v3060_v25, 3  ;;  %v176_v59 = vrot.slane %v3060_v25, 6 }
  0xb0   :  { %v3072_v29 = vperm.slane %v172_v26, 0  ;;  %v3076_v31 = vperm.slane %v171_v28, 0  ;;  %v3090_v37 = vperm.slane %v175_v33, 0  ;;  %v3092_v38 = vperm.slane %v174_v36, 0  ;;  %v3175_v26 = vpop.permute.xlu0 %1363  ;;  %v3196_v36 = vpop.permute.xlu2 %1353 }
  0xb1   :  { %v3107_v44 = vperm.slane %v177_v41, 0  ;;  %v771_v48 = vmul.f32 %v3057_v23, %v3110_v45  ;;  %v3123_v51 = vperm.slane %v173_v49, 0  ;;  %v217_v55 = vmul.f32 %v3110_v45, %v3014_v8 }
  0xb2   :  { %v773_v34 = vmul.f32 %v3067_v27, %v3072_v29  ;;  %v772_v35 = vmul.f32 %v3078_v32, %v3076_v31  ;;  %v776_v42 = vmul.f32 %v3096_v40, %v3090_v37  ;;  %v775_v43 = vmul.f32 %v3094_v39, %v3092_v38 }
  0xb3   :  { %v778_v47 = vmul.f32 %v3112_v46, %v3107_v44  ;;  %v218_v50 = vmul.f32 %v3076_v31, %v3024_v13  ;;  %v220_v53 = vmul.f32 %v3123_v51, %v3004_v2  ;;  %v219_v54 = vmul.f32 %v3072_v29, %v3006_v3  ;;  %v150_v16 = vpop.f32.mrf.mxu0 }
  0xb4   :  { %v234_v58 = vsel %vm233_vm1, %v217_v55, 0.0  ;;  %v221_v60 = vmul.f32 %v3092_v38, %v3016_v9  ;;  %v222_v61 = vmul.f32 %v3090_v37, %v3012_v7  ;;  %v3140_v62 = vperm.slane %v176_v59, 0 }
  0xb5   :  { %v237_v52 = vsel %vm233_vm1, %v218_v50, 0.0  ;;  %v243_v56 = vsel %vm233_vm1, %v220_v53, 0.0  ;;  %v240_v57 = vsel %vm233_vm1, %v219_v54, 0.0  ;;  %v224_v4 = vmul.f32 %v3107_v44, %v3026_v15 }
  0xb6   :  { %807 = vrot.lane.b32.xlu1 %v773_v34, %s2924_s28  ;;  %805 = vrot.lane.b32.xlu2 %v772_v35, %s2924_s28  ;;  %v246_v63 = vsel %vm233_vm1, %v221_v60, 0.0  ;;  %v249_v0 = vsel %vm233_vm1, %v222_v61, 0.0  ;;  %v223_v1 = vmul.f32 %v3140_v62, %v3034_v19  ;;  %v774_v10 = vmul.f32 %v3074_v30, %v3123_v51 }
  0xb7   :  { %899 = vrot.lane.b32.xlu0 %v3060_v25, %s2924_s28  ;;  %v255_v6 = vsel %vm233_vm1, %v224_v4, 0.0  ;;  %v777_v14 = vmul.f32 %v3155_v12, %v3140_v62  ;;  %v3163_v18 = vadd.f32 %v3055_v22, %v150_v16 }
  0xb8   :  { %v252_v5 = vsel %vm233_vm1, %v223_v1, 0.0 }
  0xb9   :  { %v3167_v20 = vpack.i.bf16 %v3163_v18, %v3060_v25  ;;  %v179_v21 = vrot.slane %v3163_v18, 2  ;;  %v3186_v33 = vperm.slane %v3163_v18, 0  ;;  %v178_v35 = vrot.slane %v3163_v18, 1 }
  0xba   :  { %v181_v54 = vrot.slane %v3163_v18, 4  ;;  %v183_v61 = vrot.slane %v3163_v18, 6  ;;  %v182_v1 = vrot.slane %v3163_v18, 5 }
  0xbb   :  { %v3173_v24 = vperm.slane %v179_v21, 0  ;;  %4208 = vst [vmem:[#allocation17_spill] sm:$0xff] %v3186_v33  ;;  %v779_v34 = vmul.f32 %v3057_v23, %v3186_v33  ;;  %v225_v23 = vmul.f32 %v3186_v33, %v3014_v8 }
  0xbd   :  { %4207 = vst [vmem:[#allocation16_spill] sm:$0xff] %v3173_v24  ;;  %v781_v22 = vmul.f32 %v3067_v27, %v3173_v24  ;;  %v3194_v27 = vperm.slane %v178_v35, 0  ;;  %v227_v53 = vmul.f32 %v3173_v24, %v3006_v3 }
  0xbe   :  { %813 = vrot.lane.b32.xlu1 %v776_v42, %s2924_s28  ;;  %811 = vrot.lane.b32.xlu2 %v775_v43, %s2924_s28  ;;  %v3201_v42 = vpop.permute.xlu1 %1355  ;;  %v3203_v43 = vpop.permute.xlu2 %1359 }
  0xbf   :  { %1505 = vrot.lane.b32.xlu0 %v3060_v25, %s2925_s29  ;;  %v780_v41 = vmul.f32 %v3078_v32, %v3194_v27  ;;  %v226_v16 = vmul.f32 %v3194_v27, %v3024_v13 }
  0xc6   :  { %817 = vrot.lane.b32.xlu2 %v778_v47, %s2924_s28  ;;  %v184_v47 = vrot.slane %v3163_v18, 7  ;;  %v3211_v50 = vpop.permute.xlu1 %1361 }
  0xc7   :  { %803 = vrot.lane.b32.xlu0 %v771_v48, %s2924_s28  ;;  %v258_v48 = vsel %vm233_vm1, %v225_v23, 0.0 }
  0xc8   :  { %v3209_v49 = vperm.slane %v184_v47, 0 }
  0xca   :  { %v232_v32 = vmul.f32 %v3209_v49, %v3026_v15 }
  0xcc   :  { %v279_v55 = vsel %vm233_vm1, %v232_v32, 0.0 }
  0xe8   :  { %238 = vadd.xlane.f32.xlu1 %v237_v52  ;;  %v3213_v52 = vpop.permute.xlu2 %1365 }
  0xef   :  { %244 = vadd.xlane.f32.xlu2 %v243_v56  ;;  %v264_v56 = vsel %vm233_vm1, %v227_v53, 0.0 }
  0xf0   :  { %241 = vadd.xlane.f32.xlu1 %v240_v57 }
  0xf1   :  { %235 = vadd.xlane.f32.xlu0 %v234_v58  ;;  %v3222_v58 = vperm.slane %v181_v54, 0 }
  0xf3   :  { %v229_v60 = vmul.f32 %v3222_v58, %v3016_v9 }
  0xf7   :  { %247 = vadd.xlane.f32.xlu2 %v246_v63  ;;  %v270_v63 = vsel %vm233_vm1, %v229_v60, 0.0 }
  0xf8   :  { %250 = vadd.xlane.f32.xlu1 %v249_v0  ;;  %v3230_v0 = vperm.slane %v183_v61, 0 }
  0xff   :  { %253 = vadd.xlane.f32.xlu2 %v252_v5 }
 0x100   :  { %256 = vadd.xlane.f32.xlu1 %v255_v6  ;;  %v231_v6 = vmul.f32 %v3230_v0, %v3034_v19 }
 0x102   :  { %v276_v21 = vsel %vm233_vm1, %v231_v6, 0.0 }
 0x105   :  { %809 = vrot.lane.b32.xlu0 %v774_v10, %s2924_s28 }
 0x108   :  { %v3224_v59 = vpop.permute.xlu2 %1503 }
 0x10d   :  { %815 = vrot.lane.b32.xlu0 %v777_v14, %s2924_s28  ;;  %v3241_v14 = vperm.slane %v182_v1, 0 }
 0x10f   :  { %4209 = vst [vmem:[#allocation18_spill] sm:$0xff] %v3241_v14 }
 0x110   :  { %v3239_v10 = vpop.permute.xlu2 %805 }
 0x115   :  { %2702 = vrot.lane.b32.xlu0 %v3167_v20, %s2926_s30 }
 0x117   :  { %953 = vrot.lane.b32.xlu2 %v3163_v18, %s2922_s27 }
 0x118   :  { %v3255_v47 = vpop.permute.xlu2 %811 }
 0x119   :  { %341 = vrot.lane.b32.xlu1 %v3163_v18, %s2923_s2 }
 0x11d   :  { %823 = vrot.lane.b32.xlu0 %v781_v22, %s2924_s28  ;;  %v180_v22 = vrot.slane %v3163_v18, 3 }
 0x11f   :  { %v3251_v35 = vperm.slane %v180_v22, 0  ;;  %v783_v22 = vmul.f32 %v3094_v39, %v3222_v58 }
 0x120   :  { %v902_v57 = vpop.permute.xlu1 %901 }
 0x121   :  { %v283_v28 = vpop.permute.xlu0 %282  ;;  %951 = vrot.lane.b32.xlu1 %v3163_v18, %s2924_s28 }
 0x122   :  { %2654 = vmatpush.xpose.msk.msra.mxu1 %vm233_vm1, %v283_v28  ;;  %v784_v28 = vmul.f32 %v3096_v40, %v3241_v14  ;;  %v230_v40 = vmul.f32 %v3241_v14, %v3012_v7  ;;  %v786_v14 = vmul.f32 %v3112_v46, %v3209_v49 }
 0x125   :  { %2655 = vmatmul.msk.f32.vlgmr.msra.gmra.mxu1 %vm233_vm1, %v3060_v25 }
 0x128   :  { %v3235_v5 = vpop.permute.xlu1 %807 }
 0x129   :  { %819 = vrot.lane.b32.xlu1 %v779_v34, %s2924_s28  ;;  %v3233_v4 = vpop.permute.xlu0 %899  ;;  %v261_v34 = vsel %vm233_vm1, %v226_v16, 0.0 }
 0x130   :  { %v3253_v23 = vpop.permute.xlu1 %813 }
 0x131   :  { %821 = vrot.lane.b32.xlu1 %v780_v41, %s2924_s28  ;;  %v1506_v41 = vpop.permute.xlu0 %1505 }
 0x139   :  { %v3262_v54 = vpop.permute.xlu0 %803 }
 0x140   :  { %259 = vadd.xlane.f32.xlu2 %v258_v48  ;;  %v228_v48 = vmul.f32 %v3251_v35, %v3004_v2 }
 0x142   :  { %v267_v32 = vsel %vm233_vm1, %v228_v48, 0.0 }
 0x147   :  { %280 = vadd.xlane.f32.xlu0 %v279_v55  ;;  %v3264_v55 = vpop.permute.xlu2 %817 }
 0x148   :  { %265 = vadd.xlane.f32.xlu2 %v264_v56  ;;  %v273_v56 = vsel %vm233_vm1, %v230_v40, 0.0 }
 0x150   :  { %271 = vadd.xlane.f32.xlu2 %v270_v63 }
 0x158   :  { %277 = vadd.xlane.f32.xlu2 %v276_v21 }
 0x15b   :  { %829 = vrot.lane.b32.xlu0 %v784_v28, %s2924_s28  ;;  %262 = vadd.xlane.f32.xlu1 %v261_v34  ;;  %v239_v53 = vpop.xlane.xlu1 %238 }
 0x162   :  { %v245_v63 = vpop.xlane.xlu2 %244 }
 0x163   :  { %268 = vadd.xlane.f32.xlu1 %v267_v32  ;;  %v242_v61 = vpop.xlane.xlu1 %241 }
 0x164   :  { %v236_v60 = vpop.xlane.xlu0 %235 }
 0x16a   :  { %v248_v16 = vpop.xlane.xlu2 %247 }
 0x16b   :  { %274 = vadd.xlane.f32.xlu1 %v273_v56  ;;  %v251_v6 = vpop.xlane.xlu1 %250  ;;  %v292_v56 = vlaneseq }
 0x16d   :  { %v3281_v39 = vand.u32 127, %v292_v56 }
 0x16f   :  { %v295_v46 = vperm.slane %v239_v53, %v3281_v39  ;;  %v1380_v53 = vmul.f32 %v3211_v50, %v3090_v37 }
 0x172   :  { %v254_v34 = vpop.xlane.xlu2 %253 }
 0x173   :  { %v257_v28 = vpop.xlane.xlu1 %256 }
 0x177   :  { %v3267_v1 = vpop.permute.xlu0 %809 }
 0x17a   :  { %v954_v33 = vpop.permute.xlu2 %953 }
 0x17f   :  { %v3269_v21 = vpop.permute.xlu0 %815 }
 0x184   :  { %827 = vrot.lane.b32.xlu1 %v783_v22, %s2924_s28  ;;  %v294_v22 = vperm.slane %v236_v60, %v3281_v39  ;;  %v298_v60 = vperm.slane %v248_v16, %v3281_v39  ;;  %v301_v16 = vperm.slane %v257_v28, %v3281_v39  ;;  %v851_v28 = vsel %vm233_vm1, %v3262_v54, 0.0 }
 0x187   :  { %v2703_v48 = vpop.permute.xlu0 %2702 }
 0x188   :  { %v2704_v32 = vunpack.i.l.bf16 %v2703_v48  ;;  %v2705_v40 = vunpack.i.h.bf16 %v2703_v48 }
 0x18a   :  { %692 = vmatpush.msrb.mxu1 %v2704_v32  ;;  %734 = vmatpush.msra.mxu3 %v2705_v40  ;;  %v299_v32 = vperm.slane %v251_v6, %v3281_v39 }
 0x18b   :  { %v342_v24 = vpop.permute.xlu1 %341 }
 0x18c   :  { %2660 = vmatpush.xpose.msk.msra.mxu1 %vm233_vm1, %v902_v57  ;;  %833 = vrot.lane.b32.xlu1 %v786_v14, %s2924_s28  ;;  %v1377_v57 = vmul.f32 %v3201_v42, %v3072_v29 }
 0x18d   :  { %2656 = vmatpush.xpose.msk.msra.mxu2 %vm233_vm1, %v342_v24  ;;  %v296_v24 = vperm.slane %v242_v61, %v3281_v39 }
 0x190   :  { %2657 = vmatmul.msk.f32.vlgmr.msra.gmra.mxu2 %vm233_vm1, %v3163_v18 }
 0x191   :  { %2662 = vmatpush.xpose.msk.msrb.mxu2 %vm233_vm1, %v954_v33  ;;  %v303_v33 = vsel %vm302_vm2, %v295_v46, %v294_v22  ;;  %v300_v22 = vperm.slane %v254_v34, %v3281_v39 }
 0x192   :  { %v305_v48 = vsel %vm304_vm3, %v296_v24, %v303_v33 }
 0x193   :  { %v952_v14 = vpop.permute.xlu1 %951 }
 0x194   :  { %1411 = vrot.lane.b32.xlu1 %v1377_v57, %s2921_s26 }
 0x195   :  { %2666 = vmatpush.xpose.msk.msra.mxu2 %vm233_vm1, %v1506_v41  ;;  %v297_v41 = vperm.slane %v245_v63, %v3281_v39 }
 0x197   :  { %v307_v61 = vsel %vm306_vm4, %v297_v41, %v305_v48  ;;  %v860_v48 = vsel %vm233_vm1, %v3267_v1, 0.0  ;;  %v869_v41 = vsel %vm233_vm1, %v3269_v21, 0.0 }
 0x198   :  { %2663 = vmatmul.msk.f32.vlgmr.msrb.gmra.mxu2 %vm233_vm1, %v952_v14  ;;  %v309_v40 = vsel %vm308_vm5, %v298_v60, %v307_v61  ;;  %v782_v14 = vmul.f32 %v3074_v30, %v3251_v35 }
 0x199   :  { %v311_v63 = vsel %vm310_vm6, %v299_v32, %v309_v40 }
 0x19a   :  { %v313_v46 = vsel %vm312_vm7, %v300_v22, %v311_v63 }
 0x19b   :  { %v315_v6 = vsel %vm314_vm8, %v301_v16, %v313_v46 }
 0x19c   :  { %1417 = vrot.lane.b32.xlu1 %v1380_v53, %s2921_s26 }
 0x1a0   :  { %2667 = vmatmul.msk.f32.vlgmr.msra.gmra.mxu2 %vm233_vm1, %v3224_v59  ;;  %v3316_v59 = vpop.permute.xlu1 %819 }
 0x1a2   :  { %v338_v57 = vpop.f32.mrf.mxu1 }
 0x1a3   :  { %v339_v24 = vadd.f32 %v338_v57, %v315_v6 }
 0x1a5   :  { %v391_v33 = vmul.f32 0.35355338, %v339_v24 }
 0x1a7   :  { %v393_v34 = vsel %vm233_vm1, %v391_v33, -inf }
 0x1a8   :  { %394 = vmax.xlane.f32.xlu2 %v393_v34  ;;  %v822_v60 = vpop.permute.xlu1 %821  ;;  %v3329_v34 = vpop.permute.xlu0 %823 }
 0x1a9   :  { %v878_v30 = vsel %vm233_vm1, %v822_v60, 0.0 }
 0x1b3   :  { %v260_v32 = vpop.xlane.xlu2 %259 }
 0x1b4   :  { %v351_v21 = vperm.slane %v260_v32, %v3281_v39 }
 0x1bb   :  { %v266_v54 = vpop.xlane.xlu2 %265 }
 0x1c0   :  { %825 = vrot.lane.b32.xlu2 %v782_v14, %s2924_s28  ;;  %v353_v14 = vperm.slane %v266_v54, %v3281_v39 }
 0x1c3   :  { %v272_v46 = vpop.xlane.xlu2 %271 }
 0x1c6   :  { %852 = vadd.xlane.f32.xlu1 %v851_v28 }
 0x1cb   :  { %v278_v32 = vpop.xlane.xlu2 %277 }
 0x1cc   :  { %v357_v54 = vperm.slane %v278_v32, %v3281_v39  ;;  %v1381_v32 = vmul.f32 %v3175_v26, %v3140_v62 }
 0x1ce   :  { %861 = vadd.xlane.f32.xlu1 %v860_v48  ;;  %v263_v53 = vpop.xlane.xlu1 %262 }
 0x1cf   :  { %v352_v6 = vperm.slane %v263_v53, %v3281_v39 }
 0x1d1   :  { %v359_v57 = vsel %vm302_vm2, %v352_v6, %v351_v21 }
 0x1d2   :  { %v360_v48 = vsel %vm304_vm3, %v353_v14, %v359_v57 }
 0x1d6   :  { %870 = vadd.xlane.f32.xlu1 %v869_v41  ;;  %v269_v61 = vpop.xlane.xlu1 %268 }
 0x1d7   :  { %v354_v24 = vperm.slane %v269_v61, %v3281_v39 }
 0x1d9   :  { %v361_v41 = vsel %vm306_vm4, %v354_v24, %v360_v48 }
 0x1de   :  { %879 = vadd.xlane.f32.xlu1 %v878_v30  ;;  %v275_v40 = vpop.xlane.xlu1 %274  ;;  %v355_v30 = vperm.slane %v272_v46, %v3281_v39 }
 0x1df   :  { %v356_v53 = vperm.slane %v275_v40, %v3281_v39 }
 0x1f6   :  { %v828_v22 = vpop.permute.xlu1 %827 }
 0x1f7   :  { %v887_v16 = vsel %vm233_vm1, %v828_v22, 0.0  ;;  %v362_v22 = vsel %vm308_vm5, %v355_v30, %v361_v41  ;;  %v1375_v30 = vmul.f32 %v3152_v11, %v3110_v45 }
 0x1f8   :  { %888 = vadd.xlane.f32.xlu1 %v887_v16  ;;  %v363_v61 = vsel %vm310_vm6, %v356_v53, %v362_v22  ;;  %v281_v16 = vpop.xlane.xlu0 %280  ;;  %v785_v22 = vmul.f32 %v3155_v12, %v3230_v0  ;;  %v1384_v12 = vmul.f32 %v3196_v36, %v3194_v27 }
 0x1f9   :  { %v364_v6 = vsel %vm312_vm7, %v357_v54, %v363_v61  ;;  %v358_v21 = vperm.slane %v281_v16, %v3281_v39  ;;  %v1376_v61 = vmul.f32 %v3196_v36, %v3076_v31  ;;  %v1379_v16 = vmul.f32 %v3203_v43, %v3092_v38 }
 0x1fa   :  { %v1389_v36 = vmul.f32 %v3175_v26, %v3230_v0  ;;  %v857_v26 = vsel %vm233_vm1, %v3235_v5, 0.0 }
 0x1fb   :  { %v365_v40 = vsel %vm314_vm8, %v358_v21, %v364_v6  ;;  %v863_v21 = vsel %vm233_vm1, %v3255_v47, 0.0 }
 0x1fe   :  { %v834_v63 = vpop.permute.xlu1 %833 }
 0x1ff   :  { %v896_v1 = vsel %vm233_vm1, %v834_v63, 0.0 }
 0x200   :  { %897 = vadd.xlane.f32.xlu1 %v896_v1 }
 0x206   :  { %v1412_v28 = vpop.permute.xlu1 %1411 }
 0x207   :  { %v1461_v60 = vsel %vm233_vm1, %v1412_v28, 0.0 }
 0x208   :  { %1462 = vadd.xlane.f32.xlu1 %v1461_v60 }
 0x20e   :  { %v1418_v63 = vpop.permute.xlu1 %1417 }
 0x20f   :  { %v1470_v1 = vsel %vm233_vm1, %v1418_v63, 0.0 }
 0x210   :  { %1471 = vadd.xlane.f32.xlu1 %v1470_v1 }
 0x213   :  { %v388_v57 = vpop.f32.mrf.mxu2 }
 0x214   :  { %v389_v46 = vadd.f32 %v388_v57, %v365_v40  ;;  %v872_v40 = vsel %vm233_vm1, %v3264_v55, 0.0  ;;  %v875_v55 = vsel %vm233_vm1, %v3316_v59, 0.0 }
 0x216   :  { %v3344_v24 = vmul.f32 0.35355338, %v389_v46  ;;  %v830_v46 = vpop.permute.xlu0 %829 }
 0x217   :  { %v890_v47 = vsel %vm233_vm1, %v830_v46, 0.0 }
 0x218   :  { %v396_v14 = vsel %vm233_vm1, %v3344_v24, -inf }
 0x219   :  { %397 = vmax.xlane.f32.xlu0 %v396_v14  ;;  %v866_v14 = vsel %vm233_vm1, %v3253_v23, 0.0 }
 0x21b   :  { %v395_v28 = vpop.xlane.xlu2 %394 }
 0x21c   :  { %v399_v48 = vsub.f32 %v391_v33, %v395_v28  ;;  %v1378_v33 = vmul.f32 %v3160_v17, %v3123_v51 }
 0x21e   :  { %v401_v60 = vmul.f32 1.442695, %v399_v48 }
 0x220   :  { %2721 = vpow2.f32 %v401_v60 }
 0x226   :  { %v3348_v41 = vpop.eup %2721 }
 0x227   :  { %v405_v53 = vsel %vm233_vm1, %v3348_v41, 0.0 }
 0x228   :  { %406 = vadd.xlane.f32.xlu2 %v405_v53 }
 0x229   :  { %1557 = vrot.lane.b32.xlu1 %v3163_v18, %s2925_s29 }
 0x22d   :  { %1407 = vrot.lane.b32.xlu0 %v1375_v30, %s2921_s26 }
 0x231   :  { %2107 = vrot.lane.b32.xlu1 %v3060_v25, %s2927_s8 }
 0x235   :  { %1413 = vrot.lane.b32.xlu0 %v1378_v33, %s2921_s26 }
 0x239   :  { %2161 = vrot.lane.b32.xlu1 %v3163_v18, %s2928_s11  ;;  %v3379_v54 = vpop.xlane.xlu1 %852 }
 0x23d   :  { %1419 = vrot.lane.b32.xlu0 %v1381_v32, %s2921_s26 }
 0x240   :  { %831 = vrot.lane.b32.xlu2 %v785_v22, %s2924_s28 }
 0x241   :  { %1957 = vrot.lane.b32.xlu1 %v3024_v13, %s2929_s12  ;;  %v1382_v13 = vmul.f32 %v3213_v52, %v3107_v44  ;;  %v3389_v63 = vpop.xlane.xlu1 %861 }
 0x248   :  { %1409 = vrot.lane.b32.xlu2 %v1376_v61, %s2921_s26 }
 0x249   :  { %1961 = vrot.lane.b32.xlu1 %v3004_v2, %s2929_s12  ;;  %v1386_v2 = vmul.f32 %v3160_v17, %v3251_v35  ;;  %v3395_v1 = vpop.xlane.xlu1 %870 }
 0x250   :  { %1415 = vrot.lane.b32.xlu2 %v1379_v16, %s2921_s26 }
 0x251   :  { %1965 = vrot.lane.b32.xlu1 %v3012_v7, %s2929_s12  ;;  %v854_v7 = vsel %vm233_vm1, %v3239_v10, 0.0  ;;  %v3402_v6 = vpop.xlane.xlu1 %879  ;;  %v881_v10 = vsel %vm233_vm1, %v3329_v34, 0.0  ;;  %v826_v34 = vpop.permute.xlu2 %825 }
 0x252   :  { %v884_v5 = vsel %vm233_vm1, %v826_v34, 0.0 }
 0x258   :  { %1421 = vrot.lane.b32.xlu2 %v1382_v13, %s2921_s26 }
 0x259   :  { %1425 = vrot.lane.b32.xlu1 %v1384_v12, %s2921_s26 }
 0x261   :  { %1429 = vrot.lane.b32.xlu1 %v1386_v2, %s2921_s26 }
 0x267   :  { %855 = vadd.xlane.f32.xlu0 %v854_v7 }
 0x269   :  { %1435 = vrot.lane.b32.xlu1 %v1389_v36, %s2921_s26 }
 0x26b   :  { %v3406_v17 = vpop.xlane.xlu1 %888 }
 0x26f   :  { %864 = vadd.xlane.f32.xlu0 %v863_v21 }
 0x273   :  { %v3412_v57 = vpop.xlane.xlu1 %897 }
 0x277   :  { %873 = vadd.xlane.f32.xlu0 %v872_v40 }
 0x27b   :  { %v3419_v28 = vpop.xlane.xlu1 %1462 }
 0x27f   :  { %882 = vadd.xlane.f32.xlu0 %v881_v10 }
 0x281   :  { %858 = vadd.xlane.f32.xlu2 %v857_v26 }
 0x283   :  { %v3423_v48 = vpop.xlane.xlu1 %1471 }
 0x287   :  { %891 = vadd.xlane.f32.xlu0 %v890_v47 }
 0x289   :  { %867 = vadd.xlane.f32.xlu2 %v866_v14 }
 0x28c   :  { %v3425_v60 = vpop.xlane.xlu0 %397 }
 0x291   :  { %876 = vadd.xlane.f32.xlu2 %v875_v55 }
 0x299   :  { %885 = vadd.xlane.f32.xlu2 %v884_v5 }
 0x29b   :  { %v407_v53 = vpop.xlane.xlu2 %406  ;;  %v3428_v30 = vpop.permute.xlu1 %1557 }
 0x29c   :  { %2723 = vrcp.f32 %v407_v53 }
 0x29f   :  { %v1408_v23 = vpop.permute.xlu0 %1407 }
 0x2a0   :  { %v1455_v33 = vsel %vm233_vm1, %v1408_v23, 0.0 }
 0x2a1   :  { %1456 = vadd.xlane.f32.xlu0 %v1455_v33 }
 0x2a2   :  { %v2724_v32 = vpop.eup %2723 }
 0x2a3   :  { %v3432_v59 = vmul.f32 %v2724_v32, %v3348_v41  ;;  %v832_v22 = vpop.permute.xlu2 %831  ;;  %v3434_v61 = vpop.permute.xlu1 %2107 }
 0x2a4   :  { %v893_v16 = vsel %vm233_vm1, %v832_v22, 0.0  ;;  %v964_v22 = vperm.slane %v3402_v6, %v3281_v39 }
 0x2a5   :  { %2658 = vmatmul.msk.f32.vlgmr.msrb.gmra.mxu1 %vm233_vm1, %v3432_v59  ;;  %894 = vadd.xlane.f32.xlu2 %v893_v16 }
 0x2a7   :  { %v1414_v13 = vpop.permute.xlu0 %1413 }
 0x2a8   :  { %v1464_v12 = vsel %vm233_vm1, %v1414_v13, 0.0 }
 0x2a9   :  { %1465 = vadd.xlane.f32.xlu0 %v1464_v12 }
 0x2ab   :  { %v1410_v2 = vpop.permute.xlu2 %1409  ;;  %v3440_v7 = vpop.permute.xlu1 %2161 }
 0x2ac   :  { %v1458_v36 = vsel %vm233_vm1, %v1410_v2, 0.0 }
 0x2ad   :  { %2661 = vmatmul.msk.f32.vlgmr.msra.gmra.mxu1 %vm233_vm1, %v3233_v4  ;;  %1459 = vadd.xlane.f32.xlu2 %v1458_v36 }
 0x2af   :  { %v1420_v41 = vpop.permute.xlu0 %1419 }
 0x2b0   :  { %v1473_v21 = vsel %vm233_vm1, %v1420_v41, 0.0 }
 0x2b1   :  { %1474 = vadd.xlane.f32.xlu0 %v1473_v21  ;;  %v967_v21 = vperm.slane %v3406_v17, %v3281_v39 }
 0x2b3   :  { %v1416_v40 = vpop.permute.xlu2 %1415  ;;  %v3446_v10 = vpop.permute.xlu1 %1957 }
 0x2b4   :  { %v1980_v26 = vmul.f32 %v3446_v10, %v3076_v31  ;;  %v1467_v46 = vsel %vm233_vm1, %v1416_v40, 0.0 }
 0x2b5   :  { %1468 = vadd.xlane.f32.xlu2 %v1467_v46 }
 0x2b6   :  { %2013 = vrot.lane.b32.xlu1 %v1980_v26, %s2927_s8 }
 0x2bb   :  { %v1422_v47 = vpop.permute.xlu2 %1421 }
 0x2bc   :  { %v1476_v14 = vsel %vm233_vm1, %v1422_v47, 0.0 }
 0x2bd   :  { %1477 = vadd.xlane.f32.xlu2 %v1476_v14  ;;  %v970_v14 = vperm.slane %v3412_v57, %v3281_v39 }
 0x2da   :  { %v3453_v4 = vpop.xlane.xlu0 %855 }
 0x2e2   :  { %v3455_v55 = vpop.xlane.xlu0 %864 }
 0x2ea   :  { %v3461_v53 = vpop.xlane.xlu0 %873 }
 0x2f2   :  { %v883_v23 = vpop.xlane.xlu0 %882 }
 0x2f3   :  { %v965_v12 = vperm.slane %v883_v23, %v3281_v39 }
 0x2f4   :  { %v3457_v34 = vpop.xlane.xlu2 %858 }
 0x2fa   :  { %v892_v2 = vpop.xlane.xlu0 %891 }
 0x2fb   :  { %v968_v26 = vperm.slane %v892_v2, %v3281_v39 }
 0x2fc   :  { %v3459_v5 = vpop.xlane.xlu2 %867 }
 0x304   :  { %v877_v31 = vpop.xlane.xlu2 %876 }
 0x305   :  { %v963_v33 = vperm.slane %v877_v31, %v3281_v39 }
 0x307   :  { %v971_v16 = vsel %vm302_vm2, %v964_v22, %v963_v33  ;;  %v1000_v33 = vpop.f32.mrf.mxu2 }
 0x308   :  { %v972_v36 = vsel %vm304_vm3, %v965_v12, %v971_v16 }
 0x30c   :  { %v886_v32 = vpop.xlane.xlu2 %885 }
 0x30d   :  { %v966_v13 = vperm.slane %v886_v32, %v3281_v39 }
 0x30f   :  { %v973_v41 = vsel %vm306_vm4, %v966_v13, %v972_v36 }
 0x310   :  { %v974_v40 = vsel %vm308_vm5, %v967_v21, %v973_v41  ;;  %v1517_v41 = vperm.slane %v3419_v28, %v3281_v39 }
 0x311   :  { %v975_v31 = vsel %vm310_vm6, %v968_v26, %v974_v40 }
 0x314   :  { %v1457_v6 = vpop.xlane.xlu0 %1456 }
 0x315   :  { %v1515_v2 = vperm.slane %v1457_v6, %v3281_v39  ;;  %v1520_v6 = vperm.slane %v3423_v48, %v3281_v39 }
 0x318   :  { %v895_v46 = vpop.xlane.xlu2 %894 }
 0x319   :  { %v969_v47 = vperm.slane %v895_v46, %v3281_v39 }
 0x31b   :  { %v976_v23 = vsel %vm312_vm7, %v969_v47, %v975_v31 }
 0x31c   :  { %v977_v32 = vsel %vm314_vm8, %v970_v14, %v976_v23  ;;  %v1466_v57 = vpop.xlane.xlu0 %1465 }
 0x31d   :  { %v1001_v22 = vadd.f32 %v1000_v33, %v977_v32  ;;  %v1518_v26 = vperm.slane %v1466_v57, %v3281_v39  ;;  %v1387_v57 = vmul.f32 %v3203_v43, %v3222_v58 }
 0x31f   :  { %v3481_v17 = vmul.f32 0.35355338, %v1001_v22 }
 0x320   :  { %v1460_v16 = vpop.xlane.xlu2 %1459 }
 0x321   :  { %v1516_v13 = vperm.slane %v1460_v16, %v3281_v39  ;;  %v1008_v12 = vsel %vm233_vm1, %v3481_v17, -inf  ;;  %v1552_v16 = vpop.f32.mrf.mxu2 }
 0x322   :  { %1009 = vmax.xlane.f32.xlu0 %v1008_v12 }
 0x323   :  { %v1523_v36 = vsel %vm302_vm2, %v1516_v13, %v1515_v2 }
 0x324   :  { %v1524_v21 = vsel %vm304_vm3, %v1517_v41, %v1523_v36  ;;  %v1475_v31 = vpop.xlane.xlu0 %1474  ;;  %v1390_v36 = vmul.f32 %v3213_v52, %v3209_v49 }
 0x325   :  { %v1525_v47 = vsel %vm306_vm4, %v1518_v26, %v1524_v21  ;;  %v1521_v33 = vperm.slane %v1475_v31, %v3281_v39 }
 0x328   :  { %v1469_v40 = vpop.xlane.xlu2 %1468 }
 0x329   :  { %v1519_v46 = vperm.slane %v1469_v40, %v3281_v39 }
 0x32b   :  { %v1526_v14 = vsel %vm308_vm5, %v1519_v46, %v1525_v47 }
 0x32c   :  { %v1527_v23 = vsel %vm310_vm6, %v1520_v6, %v1526_v14 }
 0x32d   :  { %v1528_v22 = vsel %vm312_vm7, %v1521_v33, %v1527_v23 }
 0x330   :  { %v1478_v28 = vpop.xlane.xlu2 %1477 }
 0x331   :  { %v1522_v32 = vperm.slane %v1478_v28, %v3281_v39 }
 0x333   :  { %v1529_v13 = vsel %vm314_vm8, %v1522_v32, %v1528_v22 }
 0x334   :  { %v1553_v12 = vadd.f32 %v1552_v16, %v1529_v13 }
 0x336   :  { %1555 = vrot.lane.b32.xlu0 %v3163_v18, %s2921_s26  ;;  %v3504_v2 = vmul.f32 0.35355338, %v1553_v12 }
 0x338   :  { %v1609_v48 = vsel %vm233_vm1, %v3504_v2, -inf }
 0x339   :  { %1610 = vmax.xlane.f32.xlu2 %v1609_v48 }
 0x33e   :  { %1969 = vrot.lane.b32.xlu0 %v3026_v15, %s2929_s12  ;;  %v4210_v15 = vld [vmem:[#allocation17_spill] sm:$0xff] }
 0x33f   :  { %v1383_v43 = vmul.f32 %v3152_v11, %v4210_v15 }
 0x346   :  { %1431 = vrot.lane.b32.xlu0 %v1387_v57, %s2921_s26 }
 0x34e   :  { %1437 = vrot.lane.b32.xlu0 %v1390_v36, %s2921_s26  ;;  %v3591_v36 = vpop.f32.mrf.mxu1 }
 0x351   :  { %2707 = vrot.lane.b32.xlu2 %v3167_v20, %s2930_s13 }
 0x359   :  { %2109 = vrot.lane.b32.xlu2 %v3060_v25, %s2928_s11 }
 0x361   :  { %1871 = vrot.lane.b32.xlu2 %v3060_v25, %s2931_s14  ;;  %v4211_v25 = vld [vmem:[#allocation16_spill] sm:$0xff] }
 0x362   :  { %v1385_v52 = vmul.f32 %v3201_v42, %v4211_v25 }
 0x369   :  { %2159 = vrot.lane.b32.xlu2 %v3163_v18, %s2927_s8 }
 0x371   :  { %1955 = vrot.lane.b32.xlu2 %v3014_v8, %s2929_s12  ;;  %v4212_v8 = vld [vmem:[#allocation18_spill] sm:$0xff] }
 0x372   :  { %v1388_v41 = vmul.f32 %v3211_v50, %v4212_v8  ;;  %v1962_v50 = vpop.permute.xlu1 %1961 }
 0x373   :  { %v1982_v6 = vmul.f32 %v1962_v50, %v3123_v51  ;;  %v1990_v12 = vmul.f32 %v1962_v50, %v3251_v35  ;;  %v911_v35 = vperm.slane %v3379_v54, %v3281_v39  ;;  %v400_v54 = vsub.f32 %v3344_v24, %v3425_v60 }
 0x374   :  { %v417_v60 = vshrl.u32 %v292_v56, 7 }
 0x376   :  { %2711 = vset.pattern.permute.xlu0 %v417_v60  ;;  %2712 = vset.pattern.permute.xlu1 %v417_v60 }
 0x377   :  { %2713 = vset.pattern.permute.xlu2 %v417_v60 }
 0x379   :  { %1959 = vrot.lane.b32.xlu2 %v3006_v3, %s2929_s12 }
 0x37a   :  { %v3554_v33 = vpop.permute.xlu1 %1965 }
 0x381   :  { %1963 = vrot.lane.b32.xlu2 %v3016_v9, %s2929_s12 }
 0x389   :  { %1967 = vrot.lane.b32.xlu2 %v3034_v19, %s2929_s12 }
 0x391   :  { %1423 = vrot.lane.b32.xlu2 %v1383_v43, %s2921_s26 }
 0x395   :  { %v1010_v47 = vpop.xlane.xlu0 %1009 }
 0x396   :  { %v1012_v24 = vsub.f32 %v3481_v17, %v1010_v47 }
 0x399   :  { %1427 = vrot.lane.b32.xlu2 %v1385_v52, %s2921_s26 }
 0x3a1   :  { %1433 = vrot.lane.b32.xlu2 %v1388_v41, %s2921_s26  ;;  %v918_v41 = vperm.slane %v3461_v53, %v3281_v39 }
 0x3a8   :  { %v3552_v23 = vpop.permute.xlu0 %1555 }
 0x3ac   :  { %v3540_v3 = vpop.xlane.xlu2 %1610 }
 0x3ad   :  { %v1615_v53 = vsub.f32 %v3504_v2, %v3540_v3 }
 0x3af   :  { %v1617_v17 = vmul.f32 1.442695, %v1615_v53 }
 0x3b0   :  { %v1970_v51 = vpop.permute.xlu0 %1969 }
 0x3b1   :  { %v1986_v22 = vmul.f32 %v1970_v51, %v3107_v44  ;;  %v1994_v48 = vmul.f32 %v1970_v51, %v3209_v49  ;;  %v916_v49 = vperm.slane %v3459_v5, %v3281_v39  ;;  %v948_v5 = vpop.f32.mrf.mxu1 }
 0x3b4   :  { %v2708_v9 = vpop.permute.xlu2 %2707 }
 0x3b5   :  { %v2710_v21 = vunpack.i.h.bf16 %v2708_v9  ;;  %v2709_v19 = vunpack.i.l.bf16 %v2708_v9 }
 0x3b7   :  { %1304 = vmatpush.msrb.mxu3 %v2709_v19  ;;  %1346 = vmatpush.msrb.mxu1 %v2710_v21 }
 0x3bc   :  { %v3542_v11 = vpop.permute.xlu2 %2109 }
 0x3c4   :  { %v1872_v40 = vpop.permute.xlu2 %1871 }
 0x3c5   :  { %1908 = vmatpush.msra.mxu1 %v1872_v40  ;;  %v1015_v40 = vmul.f32 1.442695, %v1012_v24 }
 0x3cc   :  { %v3544_v26 = vpop.permute.xlu2 %2159 }
 0x3d4   :  { %v1956_v42 = vpop.permute.xlu2 %1955 }
 0x3d5   :  { %v1979_v46 = vmul.f32 %v1956_v42, %v3110_v45  ;;  %v1984_v45 = vmul.f32 %v3554_v33, %v3090_v37  ;;  %v1987_v13 = vmul.f32 %v1956_v42, %v4210_v15  ;;  %v1988_v37 = vmul.f32 %v3446_v10, %v3194_v27 }
 0x3d6   :  { %v913_v27 = vperm.slane %v3457_v34, %v3281_v39  ;;  %v915_v34 = vperm.slane %v3455_v55, %v3281_v39 }
 0x3d7   :  { %2011 = vrot.lane.b32.xlu2 %v1979_v46, %s2927_s8 }
 0x3dc   :  { %v1960_v14 = vpop.permute.xlu2 %1959 }
 0x3dd   :  { %v1981_v31 = vmul.f32 %v1960_v14, %v3072_v29 }
 0x3df   :  { %2015 = vrot.lane.b32.xlu0 %v1981_v31, %s2927_s8  ;;  %2017 = vrot.lane.b32.xlu2 %v1982_v6, %s2927_s8 }
 0x3e4   :  { %v1964_v28 = vpop.permute.xlu2 %1963 }
 0x3e5   :  { %v1983_v32 = vmul.f32 %v1964_v28, %v3092_v38  ;;  %v1989_v38 = vmul.f32 %v1960_v14, %v4211_v25  ;;  %v1991_v44 = vmul.f32 %v1964_v28, %v3222_v58  ;;  %v914_v58 = vperm.slane %v3389_v63, %v3281_v39 }
 0x3e6   :  { %v917_v63 = vperm.slane %v3395_v1, %v3281_v39  ;;  %v403_v25 = vmul.f32 1.442695, %v400_v54 }
 0x3e7   :  { %2019 = vrot.lane.b32.xlu1 %v1983_v32, %s2927_s8  ;;  %2021 = vrot.lane.b32.xlu0 %v1984_v45, %s2927_s8  ;;  %v1992_v45 = vmul.f32 %v3554_v33, %v4212_v8 }
 0x3e8   :  { %2725 = vpow2.f32 %v403_v25 }
 0x3e9   :  { %2727 = vpow2.f32 %v1015_v40 }
 0x3ea   :  { %2729 = vpow2.f32 %v1617_v17 }
 0x3ec   :  { %v3561_v29 = vpop.permute.xlu2 %1967 }
 0x3ed   :  { %v1985_v16 = vmul.f32 %v3561_v29, %v3140_v62  ;;  %v912_v62 = vperm.slane %v3453_v4, %v3281_v39 }
 0x3ee   :  { %v3612_v1 = vpop.eup %2725 }
 0x3ef   :  { %2025 = vrot.lane.b32.xlu1 %v1986_v22, %s2927_s8  ;;  %2023 = vrot.lane.b32.xlu2 %v1985_v16, %s2927_s8  ;;  %v919_v10 = vsel %vm302_vm2, %v912_v62, %v911_v35  ;;  %v408_v56 = vsel %vm233_vm1, %v3612_v1, 0.0  ;;  %v3620_v50 = vpop.eup %2727  ;;  %v422_v22 = vperm.slane %v3432_v59, 1 }
 0x3f0   :  { %2027 = vrot.lane.b32.xlu0 %v1987_v13, %s2927_s8  ;;  %v920_v57 = vsel %vm304_vm3, %v913_v27, %v919_v10  ;;  %v1020_v47 = vsel %vm233_vm1, %v3620_v50, 0.0  ;;  %v3624_v14 = vpop.eup %2729 }
 0x3f1   :  { %v921_v4 = vsel %vm306_vm4, %v914_v58, %v920_v57  ;;  %v1621_v6 = vsel %vm233_vm1, %v3624_v14, 0.0 }
 0x3f2   :  { %v922_v15 = vsel %vm308_vm5, %v915_v34, %v921_v4 }
 0x3f3   :  { %v923_v43 = vsel %vm310_vm6, %v916_v49, %v922_v15 }
 0x3f4   :  { %v924_v52 = vsel %vm312_vm7, %v917_v63, %v923_v43  ;;  %v1424_v21 = vpop.permute.xlu2 %1423 }
 0x3f5   :  { %v925_v9 = vsel %vm314_vm8, %v918_v41, %v924_v52  ;;  %v1479_v27 = vsel %vm233_vm1, %v1424_v21, 0.0 }
 0x3f6   :  { %v949_v55 = vadd.f32 %v948_v5, %v925_v9 }
 0x3f7   :  { %2031 = vrot.lane.b32.xlu1 %v1989_v38, %s2927_s8  ;;  %2029 = vrot.lane.b32.xlu2 %v1988_v37, %s2927_s8 }
 0x3f8   :  { %2033 = vrot.lane.b32.xlu0 %v1990_v12, %s2927_s8  ;;  %v3610_v19 = vmul.f32 0.35355338, %v949_v55  ;;  %v3637_v12 = vpop.permute.xlu1 %1425 }
 0x3fa   :  { %v1005_v42 = vsel %vm233_vm1, %v3610_v19, -inf }
 0x3fc   :  { %v1428_v46 = vpop.permute.xlu2 %1427 }
 0x3fd   :  { %v1485_v2 = vsel %vm233_vm1, %v1428_v46, 0.0 }
 0x3ff   :  { %2035 = vrot.lane.b32.xlu2 %v1991_v44, %s2927_s8  ;;  %v3640_v44 = vpop.permute.xlu0 %1431 }
 0x400   :  { %v1430_v62 = vpop.permute.xlu1 %1429 }
 0x401   :  { %v1488_v4 = vsel %vm233_vm1, %v1430_v62, 0.0 }
 0x404   :  { %v1434_v3 = vpop.permute.xlu2 %1433 }
 0x405   :  { %v1494_v31 = vsel %vm233_vm1, %v1434_v3, 0.0 }
 0x407   :  { %2041 = vrot.lane.b32.xlu2 %v1994_v48, %s2927_s8  ;;  %v3644_v10 = vpop.permute.xlu0 %1437 }
 0x408   :  { %v1436_v58 = vpop.permute.xlu1 %1435 }
 0x409   :  { %v1497_v54 = vsel %vm233_vm1, %v1436_v58, 0.0 }
 0x410   :  { %v2014_v34 = vpop.permute.xlu1 %2013 }
 0x421   :  { %1006 = vmax.xlane.f32.xlu1 %v1005_v42 }
 0x422   :  { %409 = vadd.xlane.f32.xlu0 %v408_v56 }
 0x42a   :  { %1021 = vadd.xlane.f32.xlu0 %v1020_v47  ;;  %v2062_v47 = vsel %vm233_vm1, %v2014_v34, 0.0 }
 0x430   :  { %1486 = vadd.xlane.f32.xlu2 %v1485_v2 }
 0x431   :  { %v2012_v28 = vpop.permute.xlu2 %2011 }
 0x432   :  { %1622 = vadd.xlane.f32.xlu0 %v1621_v6  ;;  %v2059_v32 = vsel %vm233_vm1, %v2012_v28, 0.0  ;;  %v1491_v28 = vsel %vm233_vm1, %v3640_v44, 0.0 }
 0x438   :  { %1495 = vadd.xlane.f32.xlu2 %v1494_v31  ;;  %v429_v31 = vperm.slane %v3432_v59, 2 }
 0x439   :  { %v2018_v51 = vpop.permute.xlu2 %2017 }
 0x43a   :  { %2037 = vrot.lane.b32.xlu1 %v1992_v45, %s2927_s8  ;;  %v2068_v16 = vsel %vm233_vm1, %v2018_v51, 0.0  ;;  %v1500_v45 = vsel %vm233_vm1, %v3644_v10, 0.0 }
 0x440   :  { %2060 = vadd.xlane.f32.xlu2 %v2059_v32  ;;  %v450_v32 = vperm.slane %v3432_v59, 5 }
 0x446   :  { %427 = vperm.xlu0 %2711, %v422_v22  }
 0x448   :  { %2069 = vadd.xlane.f32.xlu2 %v2068_v16  ;;  %v464_v16 = vperm.slane %v3432_v59, 7 }
 0x449   :  { %v2024_v13 = vpop.permute.xlu2 %2023 }
 0x44a   :  { %v2077_v37 = vsel %vm233_vm1, %v2024_v13, 0.0 }
 0x450   :  { %2078 = vadd.xlane.f32.xlu2 %v2077_v37 }
 0x451   :  { %v2030_v38 = vpop.permute.xlu2 %2029  ;;  %v3648_v49 = vpop.permute.xlu0 %2015 }
 0x452   :  { %v2086_v8 = vsel %vm233_vm1, %v2030_v38, 0.0  ;;  %v2065_v51 = vsel %vm233_vm1, %v3648_v49, 0.0 }
 0x458   :  { %2087 = vadd.xlane.f32.xlu2 %v2086_v8 }
 0x459   :  { %v2036_v33 = vpop.permute.xlu2 %2035  ;;  %v2020_v15 = vpop.permute.xlu1 %2019 }
 0x45a   :  { %v2095_v48 = vsel %vm233_vm1, %v2036_v33, 0.0  ;;  %v3651_v43 = vpop.permute.xlu0 %2021  ;;  %v2071_v3 = vsel %vm233_vm1, %v2020_v15, 0.0 }
 0x45b   :  { %v2074_v13 = vsel %vm233_vm1, %v3651_v43, 0.0 }
 0x460   :  { %2096 = vadd.xlane.f32.xlu2 %v2095_v48 }
 0x461   :  { %v2042_v35 = vpop.permute.xlu2 %2041  ;;  %v2026_v63 = vpop.permute.xlu1 %2025 }
 0x462   :  { %v2104_v57 = vsel %vm233_vm1, %v2042_v35, 0.0  ;;  %v3653_v25 = vpop.permute.xlu0 %2027 }
 0x463   :  { %v2083_v38 = vsel %vm233_vm1, %v3653_v25, 0.0 }
 0x464   :  { %1480 = vadd.xlane.f32.xlu1 %v1479_v27 }
 0x468   :  { %2105 = vadd.xlane.f32.xlu2 %v2104_v57 }
 0x469   :  { %v2032_v52 = vpop.permute.xlu1 %2031 }
 0x46a   :  { %v3655_v41 = vpop.permute.xlu0 %2033 }
 0x46b   :  { %v2092_v44 = vsel %vm233_vm1, %v3655_v41, 0.0 }
 0x46c   :  { %1489 = vadd.xlane.f32.xlu1 %v1488_v4 }
 0x474   :  { %1498 = vadd.xlane.f32.xlu1 %v1497_v54 }
 0x494   :  { %v1007_v5 = vpop.xlane.xlu1 %1006 }
 0x495   :  { %v410_v9 = vpop.xlane.xlu0 %409  ;;  %v1011_v55 = vsub.f32 %v3610_v19, %v1007_v5 }
 0x496   :  { %2731 = vrcp.f32 %v410_v9 }
 0x497   :  { %v1013_v24 = vmul.f32 1.442695, %v1011_v55 }
 0x499   :  { %2733 = vpow2.f32 %v1013_v24 }
 0x49c   :  { %v2732_v60 = vpop.eup %2731 }
 0x49d   :  { %v3659_v21 = vmul.f32 %v2732_v60, %v3612_v1  ;;  %v1022_v40 = vpop.xlane.xlu0 %1021 }
 0x49e   :  { %2735 = vrcp.f32 %v1022_v40 }
 0x49f   :  { %v3661_v53 = vpop.eup %2733  ;;  %2659 = vmatmul.msk.f32.vlgmr.msra.gmra.mxu3 %vm233_vm1, %v3659_v21  ;;  %v485_v42 = vperm.slane %v3659_v21, 2  ;;  %v506_v46 = vperm.slane %v3659_v21, 5  ;;  %v478_v37 = vperm.slane %v3659_v21, 1  ;;  %v499_v33 = vperm.slane %v3659_v21, 4 }
 0x4a0   :  { %2668 = vmatpush.xpose.msk.msra.mxu3 %vm233_vm1, %v3428_v30  ;;  %v1017_v19 = vsel %vm233_vm1, %v3661_v53, 0.0  ;;  %v520_v35 = vperm.slane %v3659_v21, 7 }
 0x4a1   :  { %490 = vperm.xlu0 %2711, %v485_v42   ;;  %1018 = vadd.xlane.f32.xlu1 %v1017_v19 }
 0x4a3   :  { %v1487_v8 = vpop.xlane.xlu2 %1486 }
 0x4a4   :  { %v2736_v56 = vpop.eup %2735 }
 0x4a5   :  { %v3671_v1 = vmul.f32 %v2736_v56, %v3620_v50  ;;  %v1623_v17 = vpop.xlane.xlu0 %1622  ;;  %v1993_v50 = vmul.f32 %v3561_v29, %v3230_v0  ;;  %v1482_v29 = vsel %vm233_vm1, %v3637_v12, 0.0 }
 0x4a6   :  { %2737 = vrcp.f32 %v1623_v17 }
 0x4a7   :  { %2665 = vmatmul.msk.f32.vlgmr.msrb.gmra.mxu1 %vm233_vm1, %v3671_v1 }
 0x4a8   :  { %2674 = vmatpush.xpose.msk.msrb.mxu1 %vm233_vm1, %v3440_v7  ;;  %v2080_v7 = vsel %vm233_vm1, %v2026_v63, 0.0 }
 0x4a9   :  { %511 = vperm.xlu0 %2711, %v506_v46   ;;  %2063 = vadd.xlane.f32.xlu1 %v2062_v47 }
 0x4ab   :  { %v1496_v27 = vpop.xlane.xlu2 %1495 }
 0x4ac   :  { %v2738_v30 = vpop.eup %2737  ;;  %v2038_v6 = vpop.permute.xlu1 %2037  ;;  %v1572_v47 = vperm.slane %v1496_v27, %v3281_v39 }
 0x4ad   :  { %v3680_v2 = vmul.f32 %v2738_v30, %v3624_v14  ;;  %v2089_v14 = vsel %vm233_vm1, %v2032_v52, 0.0  ;;  %v2098_v0 = vsel %vm233_vm1, %v2038_v6, 0.0 }
 0x4af   :  { %2670 = vmatmul.msk.f32.vlgmr.msra.gmra.mxu1 %vm233_vm1, %v3680_v2 }
 0x4b1   :  { %2039 = vrot.lane.b32.xlu0 %v1993_v50, %s2927_s8  ;;  %2072 = vadd.xlane.f32.xlu1 %v2071_v3 }
 0x4b3   :  { %v2061_v58 = vpop.xlane.xlu2 %2060 }
 0x4b4   :  { %v2119_v15 = vperm.slane %v2061_v58, %v3281_v39 }
 0x4b7   :  { %2675 = vmatmul.msk.f32.vlgmr.msrb.gmra.mxu1 %vm233_vm1, %v3544_v26  ;;  %v436_v26 = vperm.slane %v3432_v59, 3 }
 0x4b8   :  { %v3713_v62 = vpop.permute.xlu0 %427 }
 0x4b9   :  { %2081 = vadd.xlane.f32.xlu1 %v2080_v7 }
 0x4c1   :  { %2090 = vadd.xlane.f32.xlu1 %v2089_v14 }
 0x4c9   :  { %2099 = vadd.xlane.f32.xlu1 %v2098_v0  ;;  %v2070_v0 = vpop.xlane.xlu2 %2069 }
 0x4d7   :  { %v1481_v22 = vpop.xlane.xlu1 %1480 }
 0x4d8   :  { %v1567_v60 = vperm.slane %v1481_v22, %v3281_v39 }
 0x4db   :  { %1483 = vadd.xlane.f32.xlu0 %v1482_v29 }
 0x4df   :  { %v1490_v12 = vpop.xlane.xlu1 %1489 }
 0x4e0   :  { %v1570_v42 = vperm.slane %v1490_v12, %v3281_v39 }
 0x4e2   :  { %434 = vperm.xlu1 %2712, %v429_v31  }
 0x4e3   :  { %1492 = vadd.xlane.f32.xlu0 %v1491_v28 }
 0x4e7   :  { %v1499_v48 = vpop.xlane.xlu1 %1498 }
 0x4e8   :  { %v1573_v30 = vperm.slane %v1499_v48, %v3281_v39 }
 0x4ea   :  { %441 = vperm.xlu1 %2712, %v436_v26   ;;  %v2122_v26 = vperm.slane %v2070_v0, %v3281_v39 }
 0x4eb   :  { %1501 = vadd.xlane.f32.xlu0 %v1500_v45  ;;  %v2079_v45 = vpop.xlane.xlu2 %2078 }
 0x4ec   :  { %v2125_v12 = vperm.slane %v2079_v45, %v3281_v39 }
 0x4f2   :  { %455 = vperm.xlu1 %2712, %v450_v32  }
 0x4f3   :  { %2066 = vadd.xlane.f32.xlu0 %v2065_v51  ;;  %v2088_v48 = vpop.xlane.xlu2 %2087 }
 0x4fa   :  { %469 = vperm.xlu1 %2712, %v464_v16  }
 0x4fb   :  { %2075 = vadd.xlane.f32.xlu0 %v2074_v13 }
 0x502   :  { %483 = vperm.xlu1 %2712, %v478_v37  }
 0x503   :  { %2084 = vadd.xlane.f32.xlu0 %v2083_v38 }
 0x50a   :  { %504 = vperm.xlu1 %2712, %v499_v33  }
 0x50b   :  { %2093 = vadd.xlane.f32.xlu0 %v2092_v44 }
 0x512   :  { %525 = vperm.xlu1 %2712, %v520_v35  }
 0x513   :  { %v3716_v10 = vpop.permute.xlu0 %490 }
 0x514   :  { %v1019_v57 = vpop.xlane.xlu1 %1018 }
 0x515   :  { %2739 = vrcp.f32 %v1019_v57 }
 0x51a   :  { %2715 = vrot.lane.b32.xlu1 %v3167_v20, %s2932_s1 }
 0x51b   :  { %v2740_v4 = vpop.eup %2739  ;;  %v3719_v49 = vpop.permute.xlu0 %511 }
 0x51c   :  { %v3722_v34 = vmul.f32 %v2740_v4, %v3661_v53  ;;  %v2064_v54 = vpop.xlane.xlu1 %2063  ;;  %v1569_v53 = vperm.slane %v1487_v8, %v3281_v39  ;;  %v2172_v4 = vperm.slane %v2088_v48, %v3281_v39  ;;  %v1111_v48 = vperm.slane %v3671_v1, 4 }
 0x51d   :  { %v2120_v43 = vperm.slane %v2064_v54, %v3281_v39 }
 0x51e   :  { %2664 = vmatmul.msk.f32.vlgmr.msrb.gmra.mxu3 %vm233_vm1, %v3722_v34  ;;  %v1034_v20 = vperm.slane %v3722_v34, 1  ;;  %v1041_v41 = vperm.slane %v3722_v34, 2 }
 0x51f   :  { %v2127_v63 = vsel %vm302_vm2, %v2120_v43, %v2119_v15  ;;  %2672 = vmatpush.xpose.msk.msrb.mxu3 %vm233_vm1, %v3542_v11  ;;  %v2097_v15 = vpop.xlane.xlu2 %2096 }
 0x522   :  { %1039 = vperm.xlu1 %2712, %v1034_v20  }
 0x523   :  { %v2040_v25 = vpop.permute.xlu0 %2039 }
 0x524   :  { %v2101_v52 = vsel %vm233_vm1, %v2040_v25, 0.0  ;;  %v2073_v5 = vpop.xlane.xlu1 %2072 }
 0x525   :  { %2102 = vadd.xlane.f32.xlu0 %v2101_v52  ;;  %v2123_v32 = vperm.slane %v2073_v5, %v3281_v39  ;;  %v2175_v52 = vperm.slane %v2097_v15, %v3281_v39 }
 0x526   :  { %2669 = vmatmul.msk.f32.vlgmr.msra.gmra.mxu3 %vm233_vm1, %v3552_v23 }
 0x52a   :  { %1046 = vperm.xlu1 %2712, %v1041_v41  }
 0x52c   :  { %v2082_v9 = vpop.xlane.xlu1 %2081 }
 0x52d   :  { %v2126_v8 = vperm.slane %v2082_v9, %v3281_v39 }
 0x52e   :  { %2673 = vmatmul.msk.f32.vlgmr.msrb.gmra.mxu3 %vm233_vm1, %v3434_v61 }
 0x534   :  { %v2091_v55 = vpop.xlane.xlu1 %2090 }
 0x53c   :  { %v2100_v11 = vpop.xlane.xlu1 %2099 }
 0x53d   :  { %v2176_v5 = vperm.slane %v2100_v11, %v3281_v39  ;;  %v3797_v11 = vpop.f32.mrf.mxu3 }
 0x54e   :  { %v1484_v24 = vpop.xlane.xlu0 %1483 }
 0x54f   :  { %v1568_v40 = vperm.slane %v1484_v24, %v3281_v39 }
 0x551   :  { %v1575_v23 = vsel %vm302_vm2, %v1568_v40, %v1567_v60 }
 0x552   :  { %v1576_v19 = vsel %vm304_vm3, %v1569_v53, %v1575_v23  ;;  %v3790_v53 = vpop.f32.mrf.mxu1 }
 0x553   :  { %v1577_v56 = vsel %vm306_vm4, %v1570_v42, %v1576_v19  ;;  %v2106_v19 = vpop.xlane.xlu2 %2105 }
 0x554   :  { %v3745_v17 = vpop.permute.xlu1 %434 }
 0x556   :  { %v1493_v61 = vpop.xlane.xlu0 %1492 }
 0x557   :  { %v1571_v46 = vperm.slane %v1493_v61, %v3281_v39 }
 0x559   :  { %v1578_v50 = vsel %vm308_vm5, %v1571_v46, %v1577_v56  ;;  %v2178_v46 = vperm.slane %v2106_v19, %v3281_v39 }
 0x55a   :  { %v1579_v3 = vsel %vm310_vm6, %v1572_v47, %v1578_v50  ;;  %v3795_v23 = vpop.f32.mrf.mxu1 }
 0x55b   :  { %v1580_v7 = vsel %vm312_vm7, %v1573_v30, %v1579_v3 }
 0x55c   :  { %v3753_v14 = vpop.permute.xlu1 %441 }
 0x55e   :  { %v1502_v6 = vpop.xlane.xlu0 %1501 }
 0x562   :  { %v2208_v30 = vpop.f32.mrf.mxu1 }
 0x564   :  { %v3755_v29 = vpop.permute.xlu1 %455 }
 0x566   :  { %v2067_v31 = vpop.xlane.xlu0 %2066 }
 0x567   :  { %v2121_v28 = vperm.slane %v2067_v31, %v3281_v39 }
 0x569   :  { %v2128_v51 = vsel %vm304_vm3, %v2121_v28, %v2127_v63  ;;  %v2173_v63 = vperm.slane %v2091_v55, %v3281_v39 }
 0x56a   :  { %v2129_v22 = vsel %vm306_vm4, %v2122_v26, %v2128_v51  ;;  %v1574_v26 = vperm.slane %v1502_v6, %v3281_v39  ;;  %v492_v6 = vperm.slane %v3659_v21, 3 }
 0x56b   :  { %v2130_v16 = vsel %vm308_vm5, %v2123_v32, %v2129_v22 }
 0x56c   :  { %v3763_v13 = vpop.permute.xlu1 %469  ;;  %v1581_v45 = vsel %vm314_vm8, %v1574_v26, %v1580_v7  ;;  %v471_v7 = vperm.slane %v3659_v21, 0 }
 0x56e   :  { %v2076_v37 = vpop.xlane.xlu0 %2075 }
 0x56f   :  { %v2124_v38 = vperm.slane %v2076_v37, %v3281_v39  ;;  %v415_v37 = vperm.slane %v3432_v59, 0 }
 0x571   :  { %v2131_v33 = vsel %vm310_vm6, %v2124_v38, %v2130_v16  ;;  %v443_v38 = vperm.slane %v3432_v59, 4 }
 0x572   :  { %v2132_v44 = vsel %vm312_vm7, %v2125_v12, %v2131_v33  ;;  %v1062_v12 = vperm.slane %v3722_v34, 5  ;;  %v1055_v33 = vperm.slane %v3722_v34, 4 }
 0x573   :  { %v3771_v27 = vsel %vm314_vm8, %v2126_v8, %v2132_v44  ;;  %v513_v8 = vperm.slane %v3659_v21, 6  ;;  %v1069_v44 = vperm.slane %v3722_v34, 6  ;;  %v3829_v21 = vld [vmem:[#allocation10 + $0x18] sm:$0xff] }
 0x574   :  { %v3773_v35 = vpop.permute.xlu1 %483 }
 0x576   :  { %v2085_v57 = vpop.xlane.xlu0 %2084 }
 0x577   :  { %v2171_v58 = vperm.slane %v2085_v57, %v3281_v39  ;;  %v3825_v57 = vld [vmem:[#allocation10 + $0x8] sm:$0xff] }
 0x579   :  { %v2179_v43 = vsel %vm302_vm2, %v2172_v4, %v2171_v58  ;;  %v3827_v58 = vld [vmem:[#allocation10 + $0x10] sm:$0xff] }
 0x57a   :  { %v2180_v41 = vsel %vm304_vm3, %v2173_v63, %v2179_v43  ;;  %v529_v4 = vmul.f32 %v3745_v17, %v3827_v58  ;;  %v1631_v43 = vperm.slane %v3680_v2, 0  ;;  %v530_v63 = vmul.f32 %v3753_v14, %v3829_v21 }
 0x57c   :  { %v3777_v54 = vpop.permute.xlu1 %504 }
 0x57e   :  { %v2094_v20 = vpop.xlane.xlu0 %2093 }
 0x57f   :  { %v2174_v25 = vperm.slane %v2094_v20, %v3281_v39 }
 0x581   :  { %v2181_v9 = vsel %vm306_vm4, %v2174_v25, %v2180_v41  ;;  %v557_v25 = vsel %vm233_vm1, %v529_v4, 0.0  ;;  %v564_v41 = vsel %vm233_vm1, %v530_v63, 0.0 }
 0x582   :  { %v2182_v24 = vsel %vm308_vm5, %v2175_v52, %v2181_v9  ;;  %v558_v9 = vrot.slane %v557_v25, 4 }
 0x583   :  { %v2183_v60 = vsel %vm310_vm6, %v2176_v5, %v2182_v24  ;;  %v3843_v24 = vld [vmem:[#allocation10 + $0x28] sm:$0xff] }
 0x584   :  { %v3788_v40 = vpop.permute.xlu1 %525  ;;  %v532_v14 = vmul.f32 %v3755_v29, %v3843_v24 }
 0x58c   :  { %v3792_v55 = vpop.permute.xlu1 %2715 }
 0x58d   :  { %v2718_v42 = vunpack.i.h.bf16 %v3792_v55 }
 0x58f   :  { %2554 = vmatpush.msrb.mxu0 %v2718_v42  ;;  %v565_v42 = vrot.slane %v564_v41, 4 }
 0x594   :  { %v3835_v15 = vpop.permute.xlu1 %1039 }
 0x598   :  { %v2103_v56 = vpop.xlane.xlu0 %2102 }
 0x599   :  { %v2177_v61 = vperm.slane %v2103_v56, %v3281_v39  ;;  %v457_v39 = vperm.slane %v3432_v59, 6  ;;  %v1090_v59 = vperm.slane %v3671_v1, 1 }
 0x59b   :  { %v2184_v47 = vsel %vm312_vm7, %v2177_v61, %v2183_v60  ;;  %v1666_v60 = vperm.slane %v3680_v2, 5  ;;  %v559_v61 = vadd.f32 %v558_v9, %v557_v25 }
 0x59c   :  { %v2185_v50 = vsel %vm314_vm8, %v2178_v46, %v2184_v47  ;;  %v3848_v19 = vpop.permute.xlu1 %1046  ;;  %v3850_v46 = vld [vmem:[#allocation10] sm:$0xff]  ;;  %v566_v47 = vadd.f32 %v565_v42, %v564_v41 }
 0x59d   :  { %v2209_v3 = vadd.f32 %v2208_v30, %v2185_v50  ;;  %v578_v30 = vsel %vm233_vm1, %v532_v14, 0.0  ;;  %v560_v26 = vrot.slane %v559_v61, 2 }
 0x59e   :  { %v579_v29 = vrot.slane %v578_v30, 4 }
 0x59f   :  { %v2212_v0 = vmul.f32 0.35355338, %v2209_v3  ;;  %v3853_v3 = vld [vmem:[#allocation10 + $0x38] sm:$0xff] }
 0x5a1   :  { %v3803_v31 = vpop.f32.mrf.mxu3  ;;  %v2216_v28 = vsel %vm233_vm1, %v2212_v0, -inf }
 0x5a2   :  { %2217 = vmax.xlane.f32.xlu2 %v2216_v28 }
 0x5a9   :  { %v1604_v32 = vpop.f32.mrf.mxu3 }
 0x5aa   :  { %v1605_v51 = vadd.f32 %v1604_v32, %v1581_v45 }
 0x5ac   :  { %v3808_v22 = vmul.f32 0.35355338, %v1605_v51  ;;  %v567_v51 = vrot.slane %v566_v47, 2 }
 0x5ae   :  { %v1612_v16 = vsel %vm233_vm1, %v3808_v22, -inf }
 0x5af   :  { %1613 = vmax.xlane.f32.xlu1 %v1612_v16  ;;  %v534_v16 = vmul.f32 %v3763_v13, %v3853_v3 }
 0x5ba   :  { %420 = vperm.xlu2 %2713, %v415_v37  }
 0x5c2   :  { %448 = vperm.xlu2 %2713, %v443_v38  }
 0x5c8   :  { %1067 = vperm.xlu1 %2712, %v1062_v12  }
 0x5ca   :  { %462 = vperm.xlu2 %2713, %v457_v39  }
 0x5d2   :  { %476 = vperm.xlu2 %2713, %v471_v7   ;;  %v561_v7 = vadd.f32 %v560_v26, %v559_v61  ;;  %v3873_v61 = vld [vmem:[#allocation10 + $0x30] sm:$0xff] }
 0x5da   :  { %497 = vperm.xlu2 %2713, %v492_v6  }
 0x5e2   :  { %518 = vperm.xlu2 %2713, %v513_v8  }
 0x5ea   :  { %1913 = vrot.lane.b32.xlu2 %v3163_v18, %s2931_s14  ;;  %v528_v18 = vmul.f32 %v3713_v62, %v3825_v57 }
 0x5ec   :  { %v550_v20 = vsel %vm233_vm1, %v528_v18, 0.0 }
 0x5ed   :  { %v551_v62 = vrot.slane %v550_v20, 4 }
 0x5ef   :  { %v552_v56 = vadd.f32 %v551_v62, %v550_v20  ;;  %v562_v20 = vrot.slane %v561_v7, 1  ;;  %v537_v62 = vmul.f32 %v3716_v10, %v3827_v58 }
 0x5f1   :  { %v553_v28 = vrot.slane %v552_v56, 2 }
 0x5f2   :  { %1060 = vperm.xlu2 %2713, %v1055_v33   ;;  %v580_v33 = vadd.f32 %v579_v29, %v578_v30 }
 0x5f3   :  { %v554_v39 = vadd.f32 %v553_v28, %v552_v56 }
 0x5f5   :  { %v555_v63 = vrot.slane %v554_v39, 1 }
 0x5f7   :  { %v556_v42 = vadd.f32 %v555_v63, %v554_v39 }
 0x5fa   :  { %1074 = vperm.xlu2 %2713, %v1069_v44   ;;  %v568_v44 = vadd.f32 %v567_v51, %v566_v47  ;;  %v563_v47 = vadd.f32 %v562_v20, %v561_v7 }
 0x5fc   :  { %v569_v9 = vrot.slane %v568_v44, 1 }
 0x5fe   :  { %v570_v26 = vadd.f32 %v569_v9, %v568_v44 }
 0x602   :  { %1095 = vperm.xlu2 %2713, %v1090_v59   ;;  %v592_v59 = vsel %vm233_vm1, %v534_v16, 0.0 }
 0x603   :  { %v593_v41 = vrot.slane %v592_v59, 4 }
 0x60a   :  { %1116 = vperm.xlu2 %2713, %v1111_v48   ;;  %v3865_v48 = vld [vmem:[#allocation10 + $0x20] sm:$0xff] }
 0x60b   :  { %v539_v44 = vmul.f32 %v3777_v54, %v3865_v48 }
 0x612   :  { %1636 = vperm.xlu2 %2713, %v1631_v43  }
 0x615   :  { %v2218_v52 = vpop.xlane.xlu2 %2217 }
 0x616   :  { %v2220_v5 = vsub.f32 %v2212_v0, %v2218_v52  ;;  %v581_v52 = vrot.slane %v580_v33, 2 }
 0x618   :  { %v2223_v17 = vmul.f32 1.442695, %v2220_v5  ;;  %v582_v30 = vadd.f32 %v581_v52, %v580_v33 }
 0x61a   :  { %2741 = vpow2.f32 %v2223_v17  ;;  %1671 = vperm.xlu2 %2713, %v1666_v60  }
 0x61d   :  { %v421_v50 = vpop.permute.xlu2 %420 }
 0x61e   :  { %v527_v0 = vmul.f32 %v421_v50, %v3850_v46  ;;  %v594_v50 = vadd.f32 %v593_v41, %v592_v59  ;;  %v1027_v41 = vperm.slane %v3722_v34, 0 }
 0x620   :  { %v3856_v45 = vpop.eup %2741  ;;  %v543_v32 = vsel %vm233_vm1, %v527_v0, 0.0 }
 0x621   :  { %v544_v37 = vrot.slane %v543_v32, 4  ;;  %v2228_v38 = vsel %vm233_vm1, %v3856_v45, 0.0 }
 0x622   :  { %2229 = vadd.xlane.f32.xlu0 %v2228_v38  ;;  %v1614_v12 = vpop.xlane.xlu1 %1613 }
 0x623   :  { %v545_v6 = vadd.f32 %v544_v37, %v543_v32  ;;  %v1616_v8 = vsub.f32 %v3808_v22, %v1614_v12  ;;  %v536_v22 = vmul.f32 %v3773_v35, %v3825_v57  ;;  %v613_v35 = vsel %vm233_vm1, %v537_v62, 0.0 }
 0x624   :  { %v614_v7 = vrot.slane %v613_v35, 4 }
 0x625   :  { %v546_v18 = vrot.slane %v545_v6, 2  ;;  %v1619_v4 = vmul.f32 1.442695, %v1616_v8  ;;  %v449_v13 = vpop.permute.xlu2 %448  ;;  %v606_v0 = vsel %vm233_vm1, %v536_v22, 0.0  ;;  %v595_v8 = vrot.slane %v594_v50, 2 }
 0x626   :  { %v531_v43 = vmul.f32 %v449_v13, %v3865_v48  ;;  %v607_v38 = vrot.slane %v606_v0, 4  ;;  %v615_v20 = vadd.f32 %v614_v7, %v613_v35  ;;  %v627_v22 = vsel %vm233_vm1, %v539_v44, 0.0 }
 0x627   :  { %v547_v25 = vadd.f32 %v546_v18, %v545_v6  ;;  %2743 = vpow2.f32 %v1619_v4  ;;  %v583_v6 = vrot.slane %v582_v30, 1  ;;  %v540_v4 = vmul.f32 %v3719_v49, %v3843_v24 }
 0x628   :  { %v571_v5 = vsel %vm233_vm1, %v531_v43, 0.0  ;;  %v608_v13 = vadd.f32 %v607_v38, %v606_v0  ;;  %v596_v52 = vadd.f32 %v595_v8, %v594_v50  ;;  %v542_v0 = vmul.f32 %v3788_v40, %v3853_v3 }
 0x629   :  { %v548_v17 = vrot.slane %v547_v25, 1  ;;  %v572_v60 = vrot.slane %v571_v5, 4  ;;  %v634_v54 = vsel %vm233_vm1, %v540_v4, 0.0  ;;  %v1048_v38 = vperm.slane %v3722_v34, 3 }
 0x62a   :  { %v635_v50 = vrot.slane %v634_v54, 4 }
 0x62b   :  { %v549_v14 = vadd.f32 %v548_v17, %v547_v25  ;;  %v573_v56 = vadd.f32 %v572_v60, %v571_v5  ;;  %v584_v25 = vadd.f32 %v583_v6, %v582_v30  ;;  %v609_v60 = vrot.slane %v608_v13, 2 }
 0x62d   :  { %v3876_v28 = vpop.eup %2743  ;;  %v666_v10 = vsel %vm302_vm2, %v556_v42, %v549_v14  ;;  %v574_v29 = vrot.slane %v573_v56, 2  ;;  %v463_v32 = vpop.permute.xlu2 %462  ;;  %v616_v14 = vrot.slane %v615_v20, 2 }
 0x62e   :  { %v667_v51 = vsel %vm304_vm3, %v563_v47, %v666_v10  ;;  %v533_v16 = vmul.f32 %v463_v32, %v3873_v61  ;;  %v1624_v37 = vsel %vm233_vm1, %v3876_v28, 0.0  ;;  %v628_v47 = vrot.slane %v627_v22, 4 }
 0x62f   :  { %v575_v12 = vadd.f32 %v574_v29, %v573_v56  ;;  %v668_v39 = vsel %vm306_vm4, %v570_v26, %v667_v51  ;;  %1625 = vadd.xlane.f32.xlu1 %v1624_v37  ;;  %v597_v56 = vrot.slane %v596_v52, 1  ;;  %v610_v10 = vadd.f32 %v609_v60, %v608_v13 }
 0x630   :  { %v585_v33 = vsel %vm233_vm1, %v533_v16, 0.0  ;;  %v617_v51 = vadd.f32 %v616_v14, %v615_v20  ;;  %v629_v37 = vadd.f32 %v628_v47, %v627_v22 }
 0x631   :  { %v576_v59 = vrot.slane %v575_v12, 1  ;;  %v586_v18 = vrot.slane %v585_v33, 4  ;;  %v598_v16 = vadd.f32 %v597_v56, %v596_v52  ;;  %v611_v44 = vrot.slane %v610_v10, 1 }
 0x632   :  { %v630_v4 = vrot.slane %v629_v37, 2  ;;  %v1083_v56 = vperm.slane %v3671_v1, 0 }
 0x633   :  { %v577_v43 = vadd.f32 %v576_v59, %v575_v12  ;;  %v587_v63 = vadd.f32 %v586_v18, %v585_v33  ;;  %v636_v12 = vadd.f32 %v635_v50, %v634_v54  ;;  %v618_v18 = vrot.slane %v617_v51, 1 }
 0x634   :  { %v612_v52 = vadd.f32 %v611_v44, %v610_v10 }
 0x635   :  { %v669_v5 = vsel %vm308_vm5, %v577_v43, %v668_v39  ;;  %v588_v62 = vrot.slane %v587_v63, 2  ;;  %v477_v9 = vpop.permute.xlu2 %476  ;;  %v648_v39 = vsel %vm233_vm1, %v542_v0, 0.0 }
 0x636   :  { %v535_v17 = vmul.f32 %v477_v9, %v3850_v46  ;;  %1032 = vperm.xlu0 %2711, %v1027_v41   ;;  %v670_v49 = vsel %vm310_vm6, %v584_v25, %v669_v5  ;;  %v649_v13 = vrot.slane %v648_v39, 4  ;;  %v619_v5 = vadd.f32 %v618_v18, %v617_v51 }
 0x637   :  { %v589_v42 = vadd.f32 %v588_v62, %v587_v63  ;;  %v637_v63 = vrot.slane %v636_v12, 2  ;;  %v631_v62 = vadd.f32 %v630_v4, %v629_v37 }
 0x638   :  { %v599_v30 = vsel %vm233_vm1, %v535_v17, 0.0  ;;  %v650_v9 = vadd.f32 %v649_v13, %v648_v39 }
 0x639   :  { %v590_v35 = vrot.slane %v589_v42, 1  ;;  %v600_v26 = vrot.slane %v599_v30, 4  ;;  %v638_v54 = vadd.f32 %v637_v63, %v636_v12 }
 0x63a   :  { %v651_v50 = vrot.slane %v650_v9, 2 }
 0x63b   :  { %v591_v29 = vadd.f32 %v590_v35, %v589_v42  ;;  %v601_v32 = vadd.f32 %v600_v26, %v599_v30  ;;  %v632_v30 = vrot.slane %v631_v62, 1  ;;  %v639_v35 = vrot.slane %v638_v54, 1 }
 0x63d   :  { %v602_v7 = vrot.slane %v601_v32, 2  ;;  %v498_v6 = vpop.permute.xlu2 %497  ;;  %v671_v8 = vsel %vm312_vm7, %v591_v29, %v670_v49  ;;  %v633_v51 = vadd.f32 %v632_v30, %v631_v62  ;;  %v640_v37 = vadd.f32 %v639_v35, %v638_v54 }
 0x63e   :  { %v538_v33 = vmul.f32 %v498_v6, %v3829_v21  ;;  %1053 = vperm.xlu0 %2711, %v1048_v38   ;;  %v3904_v40 = vsel %vm314_vm8, %v598_v16, %v671_v8  ;;  %v652_v16 = vadd.f32 %v651_v50, %v650_v9  ;;  %v2717_v38 = vunpack.i.l.bf16 %v3792_v55 }
 0x63f   :  { %v603_v59 = vadd.f32 %v602_v7, %v601_v32  ;;  %v1104_v6 = vperm.slane %v3671_v1, 3  ;;  %v1673_v62 = vperm.slane %v3680_v2, 6  ;;  %v1076_v9 = vperm.slane %v3722_v34, 7 }
 0x640   :  { %v620_v43 = vsel %vm233_vm1, %v538_v33, 0.0  ;;  %v1132_v50 = vperm.slane %v3671_v1, 7 }
 0x641   :  { %v604_v20 = vrot.slane %v603_v59, 1  ;;  %v621_v25 = vrot.slane %v620_v43, 4 }
 0x643   :  { %v605_v41 = vadd.f32 %v604_v20, %v603_v59  ;;  %v622_v22 = vadd.f32 %v621_v25, %v620_v43  ;;  %v653_v59 = vrot.slane %v652_v16, 1  ;;  %v1125_v43 = vperm.slane %v3671_v1, 6  ;;  %v2156_v20 = vpop.f32.mrf.mxu3 }
 0x644   :  { %v1645_v25 = vperm.slane %v3680_v2, 2 }
 0x645   :  { %v708_v17 = vsel %vm302_vm2, %v612_v52, %v605_v41  ;;  %v623_v49 = vrot.slane %v622_v22, 2  ;;  %v519_v60 = vpop.permute.xlu2 %518  ;;  %v654_v13 = vadd.f32 %v653_v59, %v652_v16  ;;  %v2157_v52 = vadd.f32 %v2156_v20, %v3771_v27 }
 0x646   :  { %v709_v42 = vsel %vm304_vm3, %v619_v5, %v708_v17  ;;  %v541_v14 = vmul.f32 %v519_v60, %v3873_v61  ;;  %v3931_v17 = vpop.permute.xlu1 %1067  ;;  %v1140_v27 = vmul.f32 %v3835_v15, %v3825_v57 }
 0x647   :  { %v624_v47 = vadd.f32 %v623_v49, %v622_v22  ;;  %v3924_v41 = vmul.f32 0.35355338, %v2157_v52  ;;  %v1652_v22 = vperm.slane %v3680_v2, 3 }
 0x648   :  { %v641_v0 = vsel %vm233_vm1, %v541_v14, 0.0  ;;  %1088 = vperm.xlu1 %2712, %v1083_v56  }
 0x649   :  { %v625_v26 = vrot.slane %v624_v47, 1  ;;  %v642_v10 = vrot.slane %v641_v0, 4  ;;  %v2213_v5 = vsel %vm233_vm1, %v3924_v41, -inf }
 0x64b   :  { %v626_v29 = vadd.f32 %v625_v26, %v624_v47  ;;  %v643_v32 = vadd.f32 %v642_v10, %v641_v0  ;;  %v1141_v47 = vmul.f32 %v3848_v19, %v3827_v58 }
 0x64d   :  { %v710_v12 = vsel %vm306_vm4, %v626_v29, %v709_v42  ;;  %v644_v39 = vrot.slane %v643_v32, 2  ;;  %v1914_v7 = vpop.permute.xlu2 %1913  ;;  %v1162_v42 = vsel %vm233_vm1, %v1140_v27, 0.0 }
 0x64e   :  { %1950 = vmatpush.msrb.mxu2 %v1914_v7  ;;  %v711_v8 = vsel %vm308_vm5, %v633_v51, %v710_v12  ;;  %v1163_v56 = vrot.slane %v1162_v42, 4 }
 0x64f   :  { %v645_v33 = vadd.f32 %v644_v39, %v643_v32  ;;  %v712_v44 = vsel %vm310_vm6, %v640_v37, %v711_v8 }
 0x650   :  { %2512 = vmatpush.msra.mxu2 %v2717_v38  ;;  %1109 = vperm.xlu1 %2712, %v1104_v6   ;;  %v1164_v30 = vadd.f32 %v1163_v56, %v1162_v42 }
 0x651   :  { %v646_v18 = vrot.slane %v645_v33, 1 }
 0x652   :  { %v1165_v32 = vrot.slane %v1164_v30, 2 }
 0x653   :  { %v647_v4 = vadd.f32 %v646_v18, %v645_v33 }
 0x654   :  { %v1166_v38 = vadd.f32 %v1165_v32, %v1164_v30 }
 0x655   :  { %v713_v55 = vsel %vm312_vm7, %v647_v4, %v712_v44  ;;  %v1061_v32 = vpop.permute.xlu2 %1060 }
 0x656   :  { %v3920_v63 = vsel %vm314_vm8, %v654_v13, %v713_v55 }
 0x658   :  { %1130 = vperm.xlu1 %2712, %v1125_v43  }
 0x660   :  { %1650 = vperm.xlu1 %2712, %v1645_v25  }
 0x668   :  { %2214 = vmax.xlane.f32.xlu0 %v2213_v5  ;;  %1657 = vperm.xlu1 %2712, %v1652_v22  }
 0x670   :  { %1678 = vperm.xlu1 %2712, %v1673_v62  }
 0x67c   :  { %1081 = vperm.xlu0 %2711, %v1076_v9  }
 0x695   :  { %v2230_v54 = vpop.xlane.xlu0 %2229 }
 0x696   :  { %2745 = vrcp.f32 %v2230_v54 }
 0x69c   :  { %v2746_v49 = vpop.eup %2745 }
 0x69d   :  { %v3936_v60 = vmul.f32 %v2746_v49, %v3856_v45  ;;  %v1169_v45 = vsel %vm233_vm1, %v1141_v47, 0.0 }
 0x69e   :  { %v1170_v10 = vrot.slane %v1169_v45, 4 }
 0x69f   :  { %2677 = vmatmul.msk.f32.vlgmr.msrb.gmra.mxu0 %vm233_vm1, %v3936_v60  ;;  %v2312_v14 = vperm.slane %v3936_v60, 3  ;;  %v2298_v34 = vperm.slane %v3936_v60, 1  ;;  %v2319_v0 = vperm.slane %v3936_v60, 4 }
 0x6a0   :  { %v1171_v37 = vadd.f32 %v1170_v10, %v1169_v45  ;;  %v2291_v10 = vperm.slane %v3936_v60, 0 }
 0x6a1   :  { %2317 = vperm.xlu2 %2713, %v2312_v14   ;;  %2303 = vperm.xlu1 %2712, %v2298_v34  }
 0x6a2   :  { %v1626_v15 = vpop.xlane.xlu1 %1625  ;;  %v1172_v33 = vrot.slane %v1171_v37, 2 }
 0x6a3   :  { %2747 = vrcp.f32 %v1626_v15 }
 0x6a4   :  { %v1173_v55 = vadd.f32 %v1172_v33, %v1171_v37  ;;  %v1143_v33 = vmul.f32 %v1061_v32, %v3865_v48 }
 0x6a6   :  { %v1174_v9 = vrot.slane %v1173_v55, 1 }
 0x6a8   :  { %v1033_v35 = vpop.permute.xlu0 %1032  ;;  %v1175_v49 = vadd.f32 %v1174_v9, %v1173_v55 }
 0x6a9   :  { %v2748_v26 = vpop.eup %2747  ;;  %v1139_v29 = vmul.f32 %v1033_v35, %v3850_v46  ;;  %1137 = vperm.xlu2 %2713, %v1132_v50   ;;  %2324 = vperm.xlu1 %2712, %v2319_v0   ;;  %v1097_v50 = vperm.slane %v3671_v1, 2  ;;  %v1118_v0 = vperm.slane %v3671_v1, 5  ;;  %v1638_v35 = vperm.slane %v3680_v2, 1  ;;  %v1075_v1 = vpop.permute.xlu2 %1074 }
 0x6aa   :  { %v3950_v51 = vmul.f32 %v2748_v26, %v3876_v28  ;;  %v1167_v28 = vrot.slane %v1166_v38, 1  ;;  %v1659_v26 = vperm.slane %v3680_v2, 4 }
 0x6ab   :  { %v1155_v19 = vsel %vm233_vm1, %v1139_v29, 0.0  ;;  %v2305_v29 = vperm.slane %v3936_v60, 2 }
 0x6ac   :  { %v1156_v16 = vrot.slane %v1155_v19, 4  ;;  %2671 = vmatmul.msk.f32.vlgmr.msrb.gmra.mxu2 %vm233_vm1, %v3950_v51  ;;  %v1701_v39 = vperm.slane %v3950_v51, 2  ;;  %v1694_v7 = vperm.slane %v3950_v51, 1  ;;  %v1168_v43 = vadd.f32 %v1167_v28, %v1166_v38 }
 0x6ad   :  { %v1708_v52 = vperm.slane %v3950_v51, 3  ;;  %v1715_v22 = vperm.slane %v3950_v51, 4  ;;  %v1145_v28 = vmul.f32 %v1075_v1, %v3873_v61 }
 0x6ae   :  { %v1157_v12 = vadd.f32 %v1156_v16, %v1155_v19  ;;  %v1687_v19 = vperm.slane %v3950_v51, 0  ;;  %v1722_v16 = vperm.slane %v3950_v51, 5 }
 0x6af   :  { %v1197_v55 = vsel %vm233_vm1, %v1145_v28, 0.0 }
 0x6b0   :  { %v1158_v6 = vrot.slane %v1157_v12, 2  ;;  %v1054_v8 = vpop.permute.xlu0 %1053 }
 0x6b1   :  { %v1142_v44 = vmul.f32 %v1054_v8, %v3829_v21  ;;  %1706 = vperm.xlu2 %2713, %v1701_v39   ;;  %1699 = vperm.xlu1 %2712, %v1694_v7   ;;  %v1096_v37 = vpop.permute.xlu2 %1095 }
 0x6b2   :  { %v1159_v59 = vadd.f32 %v1158_v6, %v1157_v12  ;;  %v1144_v6 = vmul.f32 %v3931_v17, %v3843_v24 }
 0x6b3   :  { %v1176_v18 = vsel %vm233_vm1, %v1142_v44, 0.0 }
 0x6b4   :  { %v1160_v4 = vrot.slane %v1159_v59, 1  ;;  %v1177_v13 = vrot.slane %v1176_v18, 4  ;;  %v1190_v8 = vsel %vm233_vm1, %v1144_v6, 0.0 }
 0x6b6   :  { %v1161_v20 = vadd.f32 %v1160_v4, %v1159_v59  ;;  %v1178_v25 = vadd.f32 %v1177_v13, %v1176_v18  ;;  %v1148_v59 = vmul.f32 %v1096_v37, %v3825_v57  ;;  %v1191_v18 = vrot.slane %v1190_v8, 4 }
 0x6b7   :  { %v1183_v4 = vsel %vm233_vm1, %v1143_v33, 0.0 }
 0x6b8   :  { %v1278_v5 = vsel %vm302_vm2, %v1168_v43, %v1161_v20  ;;  %v1179_v62 = vrot.slane %v1178_v25, 2  ;;  %v1218_v17 = vsel %vm233_vm1, %v1148_v59, 0.0 }
 0x6b9   :  { %1713 = vperm.xlu2 %2713, %v1708_v52   ;;  %1720 = vperm.xlu1 %2712, %v1715_v22   ;;  %v1279_v14 = vsel %vm304_vm3, %v1175_v49, %v1278_v5  ;;  %v1117_v12 = vpop.permute.xlu2 %1116  ;;  %v1192_v52 = vadd.f32 %v1191_v18, %v1190_v8  ;;  %v1184_v22 = vrot.slane %v1183_v4, 4  ;;  %v1198_v5 = vrot.slane %v1197_v55, 4 }
 0x6ba   :  { %v1180_v54 = vadd.f32 %v1179_v62, %v1178_v25  ;;  %v1089_v38 = vpop.permute.xlu1 %1088  ;;  %v1151_v20 = vmul.f32 %v1117_v12, %v3865_v48  ;;  %v1219_v9 = vrot.slane %v1218_v17, 4 }
 0x6bc   :  { %v1181_v27 = vrot.slane %v1180_v54, 1 }
 0x6be   :  { %v1182_v42 = vadd.f32 %v1181_v27, %v1180_v54  ;;  %v1147_v54 = vmul.f32 %v1089_v38, %v3850_v46  ;;  %v1239_v27 = vsel %vm233_vm1, %v1151_v20, 0.0 }
 0x6c0   :  { %v3964_v34 = vsel %vm306_vm4, %v1182_v42, %v1279_v14 }
 0x6c1   :  { %v1637_v7 = vpop.permute.xlu2 %1636 }
 0x6c2   :  { %v1743_v37 = vmul.f32 %v1637_v7, %v3850_v46 }
 0x6c9   :  { %v3985_v43 = vpop.permute.xlu2 %1671 }
 0x6db   :  { %v2215_v56 = vpop.xlane.xlu0 %2214 }
 0x6dc   :  { %v2219_v47 = vsub.f32 %v3924_v41, %v2215_v56  ;;  %v1680_v41 = vperm.slane %v3680_v2, 7  ;;  %v1110_v2 = vpop.permute.xlu1 %1109  ;;  %v1193_v56 = vrot.slane %v1192_v52, 2 }
 0x6de   :  { %v2221_v15 = vmul.f32 1.442695, %v2219_v47  ;;  %v1185_v47 = vadd.f32 %v1184_v22, %v1183_v4  ;;  %v1759_v4 = vsel %vm233_vm1, %v1743_v37, 0.0 }
 0x6e0   :  { %2749 = vpow2.f32 %v2221_v15  ;;  %v1199_v15 = vadd.f32 %v1198_v5, %v1197_v55 }
 0x6e4   :  { %v1131_v13 = vpop.permute.xlu1 %1130 }
 0x6e6   :  { %v2750_v30 = vpop.eup %2749 }
 0x6e7   :  { %v2225_v45 = vsel %vm233_vm1, %v2750_v30, 0.0 }
 0x6e8   :  { %2226 = vadd.xlane.f32.xlu0 %v2225_v45  ;;  %v1240_v45 = vrot.slane %v1239_v27, 4 }
 0x6ee   :  { %v1082_v39 = vpop.permute.xlu0 %1081 }
 0x6fc   :  { %1102 = vperm.xlu0 %2711, %v1097_v50   ;;  %v1211_v50 = vsel %vm233_vm1, %v1147_v54, 0.0 }
 0x6fd   :  { %v1212_v32 = vrot.slane %v1211_v50, 4 }
 0x6ff   :  { %v1213_v59 = vadd.f32 %v1212_v32, %v1211_v50 }
 0x704   :  { %1123 = vperm.xlu0 %2711, %v1118_v0   ;;  %v3999_v0 = vpop.permute.xlu2 %2317 }
 0x70c   :  { %1643 = vperm.xlu0 %2711, %v1638_v35   ;;  %v1651_v35 = vpop.permute.xlu1 %1650  ;;  %v1138_v22 = vpop.permute.xlu2 %1137 }
 0x714   :  { %1664 = vperm.xlu0 %2711, %v1659_v26   ;;  %v1194_v26 = vadd.f32 %v1193_v56, %v1192_v52 }
 0x716   :  { %v1195_v6 = vrot.slane %v1194_v26, 1 }
 0x718   :  { %v4012_v20 = vadd.f32 %v1195_v6, %v1194_v26 }
 0x71c   :  { %1685 = vperm.xlu0 %2711, %v1680_v41   ;;  %v1186_v41 = vrot.slane %v1185_v47, 2 }
 0x71e   :  { %v1187_v8 = vadd.f32 %v1186_v41, %v1185_v47  ;;  %v1745_v41 = vmul.f32 %v1651_v35, %v3827_v58 }
 0x724   :  { %2296 = vperm.xlu0 %2711, %v2291_v10   ;;  %v1150_v10 = vmul.f32 %v1110_v2, %v3829_v21 }
 0x726   :  { %v1232_v33 = vsel %vm233_vm1, %v1150_v10, 0.0 }
 0x727   :  { %v1233_v55 = vrot.slane %v1232_v33, 4 }
 0x72c   :  { %2310 = vperm.xlu0 %2711, %v2305_v29   ;;  %v1200_v29 = vrot.slane %v1199_v15, 2 }
 0x72e   :  { %v1201_v2 = vadd.f32 %v1200_v29, %v1199_v15  ;;  %v2326_v15 = vperm.slane %v3936_v60, 5 }
 0x730   :  { %v1202_v54 = vrot.slane %v1201_v2, 1 }
 0x734   :  { %1692 = vperm.xlu0 %2711, %v1687_v19   ;;  %v1146_v19 = vmul.f32 %v1082_v39, %v3853_v3 }
 0x736   :  { %v1204_v18 = vsel %vm233_vm1, %v1146_v19, 0.0 }
 0x737   :  { %v1205_v52 = vrot.slane %v1204_v18, 4 }
 0x739   :  { %v1206_v10 = vadd.f32 %v1205_v52, %v1204_v18 }
 0x73b   :  { %v1207_v18 = vrot.slane %v1206_v10, 2 }
 0x73c   :  { %1727 = vperm.xlu0 %2711, %v1722_v16   ;;  %v1241_v16 = vadd.f32 %v1240_v45, %v1239_v27  ;;  %v1760_v27 = vrot.slane %v1759_v4, 4  ;;  %v1154_v45 = vmul.f32 %v1138_v22, %v3853_v3 }
 0x73e   :  { %v1242_v7 = vrot.slane %v1241_v16, 2  ;;  %v1761_v19 = vadd.f32 %v1760_v27, %v1759_v4  ;;  %v1208_v27 = vadd.f32 %v1207_v18, %v1206_v10 }
 0x740   :  { %v1243_v56 = vadd.f32 %v1242_v7, %v1241_v16  ;;  %v1762_v4 = vrot.slane %v1761_v19, 2 }
 0x742   :  { %v1244_v7 = vrot.slane %v1243_v56, 1 }
 0x75b   :  { %v2227_v44 = vpop.xlane.xlu0 %2226 }
 0x75c   :  { %2751 = vrcp.f32 %v2227_v44 }
 0x762   :  { %v2752_v25 = vpop.eup %2751 }
 0x763   :  { %v3989_v62 = vmul.f32 %v2752_v25, %v2750_v30  ;;  %v1220_v30 = vadd.f32 %v1219_v9, %v1218_v17  ;;  %v1153_v25 = vmul.f32 %v1131_v13, %v3873_v61  ;;  %v1188_v9 = vrot.slane %v1187_v8, 1 }
 0x764   :  { %v1729_v13 = vperm.slane %v3950_v51, 6 }
 0x765   :  { %2676 = vmatmul.msk.f32.vlgmr.msra.gmra.mxu2 %vm233_vm1, %v3989_v62  ;;  %v2235_v49 = vperm.slane %v3989_v62, 0  ;;  %v2256_v42 = vperm.slane %v3989_v62, 3  ;;  %v2242_v14 = vperm.slane %v3989_v62, 1  ;;  %v1221_v1 = vrot.slane %v1220_v30, 2 }
 0x766   :  { %v2249_v38 = vperm.slane %v3989_v62, 2  ;;  %v2277_v12 = vperm.slane %v3989_v62, 6  ;;  %v2263_v28 = vperm.slane %v3989_v62, 4  ;;  %v2270_v50 = vperm.slane %v3989_v62, 5 }
 0x767   :  { %2240 = vperm.xlu2 %2713, %v2235_v49   ;;  %2261 = vperm.xlu1 %2712, %v2256_v42   ;;  %v1222_v46 = vadd.f32 %v1221_v1, %v1220_v30  ;;  %v1214_v49 = vrot.slane %v1213_v59, 2  ;;  %v1658_v42 = vpop.permute.xlu1 %1657  ;;  %v1234_v30 = vadd.f32 %v1233_v55, %v1232_v33  ;;  %v1253_v26 = vsel %vm233_vm1, %v1153_v25, 0.0 }
 0x768   :  { %2247 = vperm.xlu0 %2711, %v2242_v14   ;;  %v1189_v37 = vadd.f32 %v1188_v9, %v1187_v8  ;;  %v1746_v6 = vmul.f32 %v1658_v42, %v3829_v21  ;;  %v1254_v33 = vrot.slane %v1253_v26, 4  ;;  %v1748_v8 = vmul.f32 %v3985_v43, %v3843_v24 }
 0x769   :  { %v1223_v14 = vrot.slane %v1222_v46, 1  ;;  %v1215_v1 = vadd.f32 %v1214_v49, %v1213_v59  ;;  %v1773_v59 = vsel %vm233_vm1, %v1745_v41, 0.0  ;;  %v2284_v9 = vperm.slane %v3989_v62, 7 }
 0x76a   :  { %v1780_v21 = vsel %vm233_vm1, %v1746_v6, 0.0  ;;  %v1255_v25 = vadd.f32 %v1254_v33, %v1253_v26  ;;  %v1774_v52 = vrot.slane %v1773_v59, 4  ;;  %v1281_v6 = vsel %vm308_vm5, %v1189_v37, %v3964_v34 }
 0x76c   :  { %v1256_v62 = vrot.slane %v1255_v25, 2 }
 0x76e   :  { %v1103_v44 = vpop.permute.xlu0 %1102 }
 0x76f   :  { %v1149_v39 = vmul.f32 %v1103_v44, %v3827_v58  ;;  %2254 = vperm.xlu2 %2713, %v2249_v38   ;;  %2282 = vperm.xlu1 %2712, %v2277_v12   ;;  %v4022_v38 = vadd.f32 %v1202_v54, %v1201_v2  ;;  %v1224_v12 = vadd.f32 %v1223_v14, %v1222_v46  ;;  %v1260_v44 = vsel %vm233_vm1, %v1154_v45, 0.0  ;;  %v1679_v22 = vpop.permute.xlu1 %1678 }
 0x770   :  { %2268 = vperm.xlu0 %2711, %v2263_v28   ;;  %v1235_v28 = vrot.slane %v1234_v30, 2  ;;  %v1216_v2 = vrot.slane %v1215_v1, 1  ;;  %v1261_v46 = vrot.slane %v1260_v44, 4  ;;  %v2333_v14 = vperm.slane %v3936_v60, 6 }
 0x771   :  { %v1225_v17 = vsel %vm233_vm1, %v1149_v39, 0.0  ;;  %v1794_v45 = vsel %vm233_vm1, %v1748_v8, 0.0 }
 0x772   :  { %v1226_v5 = vrot.slane %v1225_v17, 4  ;;  %v1236_v54 = vadd.f32 %v1235_v28, %v1234_v30  ;;  %v1217_v43 = vadd.f32 %v1216_v2, %v1215_v1  ;;  %v1775_v30 = vadd.f32 %v1774_v52, %v1773_v59 }
 0x773   :  { %v1795_v1 = vrot.slane %v1794_v45, 4  ;;  %v1257_v28 = vadd.f32 %v1256_v62, %v1255_v25 }
 0x774   :  { %v1227_v47 = vadd.f32 %v1226_v5, %v1225_v17  ;;  %v2340_v17 = vperm.slane %v3936_v60, 7  ;;  %v1763_v60 = vadd.f32 %v1762_v4, %v1761_v19  ;;  %v1736_v19 = vperm.slane %v3950_v51, 7 }
 0x775   :  { %v1796_v8 = vadd.f32 %v1795_v1, %v1794_v45  ;;  %v1258_v25 = vrot.slane %v1257_v28, 1 }
 0x776   :  { %v1228_v29 = vrot.slane %v1227_v47, 2  ;;  %v1124_v32 = vpop.permute.xlu0 %1123 }
 0x777   :  { %v1152_v16 = vmul.f32 %v1124_v32, %v3843_v24  ;;  %2275 = vperm.xlu2 %2713, %v2270_v50   ;;  %2331 = vperm.xlu1 %2712, %v2326_v15   ;;  %v1245_v24 = vadd.f32 %v1244_v7, %v1243_v56  ;;  %v1749_v50 = vmul.f32 %v1679_v22, %v3873_v61  ;;  %v1237_v56 = vrot.slane %v1236_v54, 1 }
 0x778   :  { %1734 = vperm.xlu0 %2711, %v1729_v13   ;;  %v1229_v58 = vadd.f32 %v1228_v29, %v1227_v47  ;;  %v1781_v47 = vrot.slane %v1780_v21, 4  ;;  %v1262_v13 = vadd.f32 %v1261_v46, %v1260_v44  ;;  %v1209_v29 = vrot.slane %v1208_v27, 1 }
 0x779   :  { %v1246_v35 = vsel %vm233_vm1, %v1152_v16, 0.0  ;;  %v1801_v61 = vsel %vm233_vm1, %v1749_v50, 0.0  ;;  %v1238_v18 = vadd.f32 %v1237_v56, %v1236_v54  ;;  %v1259_v50 = vadd.f32 %v1258_v25, %v1257_v28  ;;  %v1707_v25 = vpop.permute.xlu2 %1706 }
 0x77a   :  { %v1247_v39 = vrot.slane %v1246_v35, 4  ;;  %v1230_v5 = vrot.slane %v1229_v58, 1  ;;  %v1782_v16 = vadd.f32 %v1781_v47, %v1780_v21  ;;  %v1263_v33 = vrot.slane %v1262_v13, 2 }
 0x77b   :  { %v1802_v37 = vrot.slane %v1801_v61, 4 }
 0x77c   :  { %v1248_v55 = vadd.f32 %v1247_v39, %v1246_v35  ;;  %v1231_v41 = vadd.f32 %v1230_v5, %v1229_v58  ;;  %v1776_v58 = vrot.slane %v1775_v30, 2  ;;  %v1210_v39 = vadd.f32 %v1209_v29, %v1208_v27 }
 0x77d   :  { %v1783_v34 = vrot.slane %v1782_v16, 2  ;;  %v1264_v21 = vadd.f32 %v1263_v33, %v1262_v13  ;;  %v1764_v5 = vrot.slane %v1763_v60, 1  ;;  %v1797_v27 = vrot.slane %v1796_v8, 2 }
 0x77e   :  { %v1249_v49 = vrot.slane %v1248_v55, 2  ;;  %v1644_v42 = vpop.permute.xlu0 %1643  ;;  %v1777_v51 = vadd.f32 %v1776_v58, %v1775_v30 }
 0x77f   :  { %v1744_v15 = vmul.f32 %v1644_v42, %v3825_v57  ;;  %2289 = vperm.xlu2 %2713, %v2284_v9   ;;  %2345 = vperm.xlu1 %2712, %v2340_v17   ;;  %v1320_v57 = vsel %vm302_vm2, %v1224_v12, %v1217_v43  ;;  %v1282_v12 = vsel %vm310_vm6, %v4012_v20, %v1281_v6  ;;  %v1265_v43 = vrot.slane %v1264_v21, 1 }
 0x780   :  { %v1250_v26 = vadd.f32 %v1249_v49, %v1248_v55  ;;  %2338 = vperm.xlu0 %2711, %v2333_v14   ;;  %v1321_v59 = vsel %vm304_vm3, %v1231_v41, %v1320_v57  ;;  %v1283_v22 = vsel %vm312_vm7, %v4022_v38, %v1282_v12  ;;  %v1784_v49 = vadd.f32 %v1783_v34, %v1782_v16 }
 0x781   :  { %v1766_v10 = vsel %vm233_vm1, %v1744_v15, 0.0  ;;  %v1322_v17 = vsel %vm306_vm4, %v1238_v18, %v1321_v59  ;;  %v1284_v54 = vsel %vm314_vm8, %v1210_v39, %v1283_v22  ;;  %v1803_v42 = vadd.f32 %v1802_v37, %v1801_v61  ;;  %v1714_v22 = vpop.permute.xlu2 %1713 }
 0x782   :  { %v1767_v32 = vrot.slane %v1766_v10, 4  ;;  %v1251_v44 = vrot.slane %v1250_v26, 1  ;;  %v1323_v14 = vsel %vm308_vm5, %v1245_v24, %v1322_v17  ;;  %v1778_v13 = vrot.slane %v1777_v51, 1 }
 0x783   :  { %v1765_v38 = vadd.f32 %v1764_v5, %v1763_v60  ;;  %v1798_v41 = vadd.f32 %v1797_v27, %v1796_v8  ;;  %v1785_v29 = vrot.slane %v1784_v49, 1  ;;  %v2753_v5 = vld [vmem:[#allocation10 + $0x10] sm:$0xff]  ;;  %v4072_v27 = vld [vmem:[#allocation10 + $0x18] sm:$0xff] }
 0x784   :  { %v1768_v35 = vadd.f32 %v1767_v32, %v1766_v10  ;;  %v1252_v46 = vadd.f32 %v1251_v44, %v1250_v26  ;;  %v1307_v26 = vadd.f32 %v3803_v31, %v1284_v54  ;;  %v1804_v10 = vrot.slane %v1803_v42, 2 }
 0x785   :  { %v1266_v32 = vadd.f32 %v1265_v43, %v1264_v21  ;;  %v1779_v16 = vadd.f32 %v1778_v13, %v1777_v51 }
 0x786   :  { %v1769_v7 = vrot.slane %v1768_v35, 2  ;;  %v1665_v4 = vpop.permute.xlu0 %1664  ;;  %v1324_v45 = vsel %vm310_vm6, %v1252_v46, %v1323_v14  ;;  %v1805_v33 = vadd.f32 %v1804_v10, %v1803_v42  ;;  %v4075_v42 = vld [vmem:[#allocation10 + $0x8] sm:$0xff] }
 0x787   :  { %v1747_v2 = vmul.f32 %v1665_v4, %v3865_v48  ;;  %1741 = vperm.xlu2 %2713, %v1736_v19   ;;  %v1325_v24 = vsel %vm312_vm7, %v1259_v50, %v1324_v45 }
 0x788   :  { %v1770_v55 = vadd.f32 %v1769_v7, %v1768_v35  ;;  %v1326_v61 = vsel %vm314_vm8, %v1266_v32, %v1325_v24  ;;  %v1786_v35 = vadd.f32 %v1785_v29, %v1784_v49  ;;  %v1806_v39 = vrot.slane %v1805_v33, 1  ;;  %v2756_v32 = vld [vmem:[#allocation10] sm:$0xff] }
 0x789   :  { %v1787_v52 = vsel %vm233_vm1, %v1747_v2, 0.0  ;;  %v1349_v59 = vadd.f32 %v3790_v53, %v1326_v61  ;;  %v1754_v49 = vmul.f32 %v4072_v27, %v1714_v22 }
 0x78a   :  { %v1771_v20 = vrot.slane %v1770_v55, 1  ;;  %v1788_v9 = vrot.slane %v1787_v52, 4  ;;  %v1807_v37 = vadd.f32 %v1806_v39, %v1805_v33 }
 0x78b   :  { %v1836_v50 = vsel %vm233_vm1, %v1754_v49, 0.0 }
 0x78c   :  { %v1772_v47 = vadd.f32 %v1771_v20, %v1770_v55  ;;  %v1789_v15 = vadd.f32 %v1788_v9, %v1787_v52  ;;  %v2304_v55 = vpop.permute.xlu1 %2303  ;;  %v1753_v20 = vmul.f32 %v2753_v5, %v1707_v25  ;;  %v1837_v10 = vrot.slane %v1836_v50, 4 }
 0x78e   :  { %v1790_v62 = vrot.slane %v1789_v15, 2  ;;  %v1686_v30 = vpop.permute.xlu0 %1685  ;;  %v1882_v1 = vsel %vm302_vm2, %v1772_v47, %v1765_v38  ;;  %v1829_v54 = vsel %vm233_vm1, %v1753_v20, 0.0 }
 0x78f   :  { %v1750_v56 = vmul.f32 %v1686_v30, %v3853_v3  ;;  %2561 = vrot.lane.b32.xlu2 %v1307_v26, %s2915_s10  ;;  %v1883_v44 = vsel %vm304_vm3, %v1779_v16, %v1882_v1  ;;  %v1799_v3 = vrot.slane %v1798_v41, 1  ;;  %v1830_v45 = vrot.slane %v1829_v54, 4 }
 0x790   :  { %v1791_v57 = vadd.f32 %v1790_v62, %v1789_v15  ;;  %v1884_v19 = vsel %vm306_vm4, %v1786_v35, %v1883_v44  ;;  %v2358_v15 = vmul.f32 %v4072_v27, %v3999_v0 }
 0x791   :  { %v1808_v6 = vsel %vm233_vm1, %v1750_v56, 0.0  ;;  %v1800_v4 = vadd.f32 %v1799_v3, %v1798_v41  ;;  %v1831_v41 = vadd.f32 %v1830_v45, %v1829_v54 }
 0x792   :  { %v1792_v31 = vrot.slane %v1791_v57, 1  ;;  %v1809_v60 = vrot.slane %v1808_v6, 4  ;;  %v2440_v30 = vsel %vm233_vm1, %v2358_v15, 0.0 }
 0x794   :  { %v1793_v28 = vadd.f32 %v1792_v31, %v1791_v57  ;;  %v1810_v58 = vadd.f32 %v1809_v60, %v1808_v6  ;;  %v2325_v17 = vpop.permute.xlu1 %2324  ;;  %v2441_v57 = vrot.slane %v2440_v30, 4  ;;  %v1832_v6 = vrot.slane %v1831_v41, 2 }
 0x795   :  { %v2359_v16 = vmul.f32 %v2325_v17, %v3865_v48  ;;  %v1838_v31 = vadd.f32 %v1837_v10, %v1836_v50 }
 0x796   :  { %v1811_v18 = vrot.slane %v1810_v58, 2  ;;  %v1885_v7 = vsel %vm308_vm5, %v1793_v28, %v1884_v19  ;;  %v2297_v51 = vpop.permute.xlu0 %2296  ;;  %v2442_v28 = vadd.f32 %v2441_v57, %v2440_v30 }
 0x797   :  { %2563 = vrot.lane.b32.xlu2 %v1349_v59, %s2915_s10  ;;  %v1886_v34 = vsel %vm310_vm6, %v1800_v4, %v1885_v7  ;;  %v2355_v33 = vmul.f32 %v2756_v32, %v2297_v51  ;;  %v1833_v59 = vadd.f32 %v1832_v6, %v1831_v41  ;;  %v1839_v19 = vrot.slane %v1838_v31, 2 }
 0x798   :  { %v1812_v12 = vadd.f32 %v1811_v18, %v1810_v58  ;;  %v1887_v21 = vsel %vm312_vm7, %v1807_v37, %v1886_v34  ;;  %v2447_v58 = vsel %vm233_vm1, %v2359_v16, 0.0 }
 0x799   :  { %v2419_v4 = vsel %vm233_vm1, %v2355_v33, 0.0  ;;  %v1834_v51 = vrot.slane %v1833_v59, 1 }
 0x79a   :  { %v1813_v8 = vrot.slane %v1812_v12, 1 }
 0x79c   :  { %v1814_v2 = vadd.f32 %v1813_v8, %v1812_v12  ;;  %v1700_v52 = vpop.permute.xlu1 %1699  ;;  %v2448_v8 = vrot.slane %v2447_v58, 4 }
 0x79d   :  { %v1752_v47 = vmul.f32 %v4075_v42, %v1700_v52  ;;  %v1840_v52 = vadd.f32 %v1839_v19, %v1838_v31 }
 0x79e   :  { %v1888_v46 = vsel %vm314_vm8, %v1814_v2, %v1887_v21  ;;  %v2311_v9 = vpop.permute.xlu0 %2310  ;;  %v2443_v21 = vrot.slane %v2442_v28, 2  ;;  %v2449_v54 = vadd.f32 %v2448_v8, %v2447_v58 }
 0x79f   :  { %v1911_v53 = vadd.f32 %v3795_v23, %v1888_v46  ;;  %v2356_v23 = vmul.f32 %v4075_v42, %v2304_v55  ;;  %v1822_v38 = vsel %vm233_vm1, %v1752_v47, 0.0  ;;  %v2357_v37 = vmul.f32 %v2753_v5, %v2311_v9 }
 0x7a0   :  { %v1823_v29 = vrot.slane %v1822_v38, 4  ;;  %v2420_v55 = vrot.slane %v2419_v4, 4  ;;  %v4098_v47 = vadd.f32 %v2443_v21, %v2442_v28  ;;  %v2450_v41 = vrot.slane %v2449_v54, 2 }
 0x7a1   :  { %2569 = vrot.lane.b32.xlu0 %v1911_v53, %s2920_s6  ;;  %v2426_v26 = vsel %vm233_vm1, %v2356_v23, 0.0  ;;  %v2433_v23 = vsel %vm233_vm1, %v2357_v37, 0.0 }
 0x7a2   :  { %v2427_v56 = vrot.slane %v2426_v26, 4  ;;  %v1824_v3 = vadd.f32 %v1823_v29, %v1822_v38  ;;  %v2421_v45 = vadd.f32 %v2420_v55, %v2419_v4  ;;  %v2434_v38 = vrot.slane %v2433_v23, 4 }
 0x7a4   :  { %v1721_v14 = vpop.permute.xlu1 %1720  ;;  %v2428_v61 = vadd.f32 %v2427_v56, %v2426_v26  ;;  %v1825_v34 = vrot.slane %v1824_v3, 2  ;;  %v1841_v26 = vrot.slane %v1840_v52, 1 }
 0x7a5   :  { %v1755_v13 = vmul.f32 %v1721_v14, %v3865_v48  ;;  %v4094_v14 = vld [vmem:[#allocation10 + $0x28] sm:$0xff] }
 0x7a6   :  { %v1693_v62 = vpop.permute.xlu0 %1692  ;;  %v2429_v7 = vrot.slane %v2428_v61, 2  ;;  %v1826_v49 = vadd.f32 %v1825_v34, %v1824_v3 }
 0x7a7   :  { %v1843_v24 = vsel %vm233_vm1, %v1755_v13, 0.0  ;;  %v1751_v0 = vmul.f32 %v2756_v32, %v1693_v62  ;;  %v4100_v13 = vadd.f32 %v1834_v51, %v1833_v59 }
 0x7a8   :  { %v1844_v60 = vrot.slane %v1843_v24, 4  ;;  %v2430_v22 = vadd.f32 %v2429_v7, %v2428_v61  ;;  %v1827_v10 = vrot.slane %v1826_v49, 1 }
 0x7a9   :  { %v1815_v35 = vsel %vm233_vm1, %v1751_v0, 0.0 }
 0x7aa   :  { %v1845_v18 = vadd.f32 %v1844_v60, %v1843_v24  ;;  %v1816_v48 = vrot.slane %v1815_v35, 4  ;;  %v2431_v30 = vrot.slane %v2430_v22, 1  ;;  %v2422_v60 = vrot.slane %v2421_v45, 2 }
 0x7ab   :  { %v1828_v34 = vadd.f32 %v1827_v10, %v1826_v49 }
 0x7ac   :  { %v1846_v53 = vrot.slane %v1845_v18, 2  ;;  %v1817_v20 = vadd.f32 %v1816_v48, %v1815_v35  ;;  %v4114_v7 = vadd.f32 %v2431_v30, %v2430_v22  ;;  %v4116_v48 = vadd.f32 %v2450_v41, %v2449_v54 }
 0x7ae   :  { %v1728_v46 = vpop.permute.xlu0 %1727  ;;  %v1847_v15 = vadd.f32 %v1846_v53, %v1845_v18  ;;  %v1818_v62 = vrot.slane %v1817_v20, 2 }
 0x7b0   :  { %v1848_v31 = vrot.slane %v1847_v15, 1  ;;  %v1819_v3 = vadd.f32 %v1818_v62, %v1817_v20 }
 0x7b2   :  { %v4118_v37 = vadd.f32 %v1848_v31, %v1847_v15  ;;  %v2760_v15 = vld [vmem:[#allocation10 + $0x20] sm:$0xff] }
 0x7c1   :  { %v2241_v43 = vpop.permute.xlu2 %2240 }
 0x7c2   :  { %v2347_v44 = vmul.f32 %v2756_v32, %v2241_v43 }
 0x7c4   :  { %v2363_v12 = vsel %vm233_vm1, %v2347_v44, 0.0  ;;  %v2435_v44 = vadd.f32 %v2434_v38, %v2433_v23  ;;  %v4123_v23 = vld [vmem:[#allocation10 + $0x30] sm:$0xff] }
 0x7c5   :  { %v2364_v17 = vrot.slane %v2363_v12, 4 }
 0x7c6   :  { %v2436_v53 = vrot.slane %v2435_v44, 2 }
 0x7c7   :  { %v2365_v50 = vadd.f32 %v2364_v17, %v2363_v12 }
 0x7c9   :  { %v2255_v1 = vpop.permute.xlu2 %2254  ;;  %v2366_v61 = vrot.slane %v2365_v50, 2 }
 0x7ca   :  { %v2349_v39 = vmul.f32 %v2753_v5, %v2255_v1  ;;  %v1756_v5 = vmul.f32 %v4094_v14, %v1728_v46  ;;  %v4104_v1 = vld [vmem:[#allocation10 + $0x38] sm:$0xff]  ;;  %v4120_v46 = vadd.f32 %v2422_v60, %v2421_v45 }
 0x7cc   :  { %v2377_v25 = vsel %vm233_vm1, %v2349_v39, 0.0  ;;  %v1850_v56 = vsel %vm233_vm1, %v1756_v5, 0.0  ;;  %v4112_v39 = vadd.f32 %v1841_v26, %v1840_v52 }
 0x7cd   :  { %v2378_v9 = vrot.slane %v2377_v25, 4  ;;  %v1851_v58 = vrot.slane %v1850_v56, 4 }
 0x7cf   :  { %v2379_v32 = vadd.f32 %v2378_v9, %v2377_v25  ;;  %v1852_v55 = vadd.f32 %v1851_v58, %v1850_v56 }
 0x7d1   :  { %v2276_v2 = vpop.permute.xlu2 %2275  ;;  %v1853_v30 = vrot.slane %v1852_v55, 2 }
 0x7d2   :  { %v2352_v43 = vmul.f32 %v4094_v14, %v2276_v2  ;;  %v1820_v2 = vrot.slane %v1819_v3, 1 }
 0x7d3   :  { %v1854_v58 = vadd.f32 %v1853_v30, %v1852_v55 }
 0x7d4   :  { %v2398_v0 = vsel %vm233_vm1, %v2352_v43, 0.0 }
 0x7d5   :  { %v2399_v59 = vrot.slane %v2398_v0, 4 }
 0x7d7   :  { %v2400_v17 = vadd.f32 %v2399_v59, %v2398_v0 }
 0x7d9   :  { %v2290_v24 = vpop.permute.xlu2 %2289  ;;  %v2262_v29 = vpop.permute.xlu1 %2261  ;;  %v2401_v41 = vrot.slane %v2400_v17, 2 }
 0x7da   :  { %v2354_v57 = vmul.f32 %v4104_v1, %v2290_v24  ;;  %v2248_v16 = vpop.permute.xlu0 %2247  ;;  %v2350_v6 = vmul.f32 %v4072_v27, %v2262_v29  ;;  %v2380_v27 = vrot.slane %v2379_v32, 2 }
 0x7db   :  { %v2348_v33 = vmul.f32 %v4075_v42, %v2248_v16  ;;  %v2367_v42 = vadd.f32 %v2366_v61, %v2365_v50  ;;  %v1821_v50 = vadd.f32 %v1820_v2, %v1819_v3  ;;  %v2402_v59 = vadd.f32 %v2401_v41, %v2400_v17  ;;  %v4136_v17 = vpop.f32.mrf.mxu2 }
 0x7dc   :  { %v2412_v35 = vsel %vm233_vm1, %v2354_v57, 0.0  ;;  %v2384_v28 = vsel %vm233_vm1, %v2350_v6, 0.0  ;;  %v2381_v52 = vadd.f32 %v2380_v27, %v2379_v32  ;;  %v2424_v57 = vrot.slane %v4120_v46, 1 }
 0x7dd   :  { %v2370_v19 = vsel %vm233_vm1, %v2348_v33, 0.0  ;;  %v2385_v18 = vrot.slane %v2384_v28, 4  ;;  %v2413_v12 = vrot.slane %v2412_v35, 4  ;;  %v2368_v5 = vrot.slane %v2367_v42, 1 }
 0x7de   :  { %v2371_v4 = vrot.slane %v2370_v19, 4  ;;  %v2382_v24 = vrot.slane %v2381_v52, 1 }
 0x7df   :  { %v2386_v8 = vadd.f32 %v2385_v18, %v2384_v28  ;;  %v2414_v9 = vadd.f32 %v2413_v12, %v2412_v35  ;;  %v2369_v16 = vadd.f32 %v2368_v5, %v2367_v42  ;;  %v2437_v35 = vadd.f32 %v2436_v53, %v2435_v44 }
 0x7e0   :  { %v2372_v21 = vadd.f32 %v2371_v4, %v2370_v19  ;;  %v1924_v28 = vsel %vm302_vm2, %v1828_v34, %v1821_v50  ;;  %v2383_v18 = vadd.f32 %v2382_v24, %v2381_v52 }
 0x7e1   :  { %v1742_v25 = vpop.permute.xlu2 %1741  ;;  %v2283_v51 = vpop.permute.xlu1 %2282  ;;  %v2387_v43 = vrot.slane %v2386_v8, 2  ;;  %v2415_v6 = vrot.slane %v2414_v9, 2  ;;  %v1925_v44 = vsel %vm304_vm3, %v4100_v13, %v1924_v28  ;;  %v2593_v28 = vld [vmem:[#allocation7 + $0x10] sm:$0xff] }
 0x7e2   :  { %v2373_v22 = vrot.slane %v2372_v21, 2  ;;  %v1758_v20 = vmul.f32 %v4104_v1, %v1742_v25  ;;  %v2269_v54 = vpop.permute.xlu0 %2268  ;;  %v2353_v49 = vmul.f32 %v4123_v23, %v2283_v51  ;;  %v2403_v51 = vrot.slane %v2402_v59, 1 }
 0x7e3   :  { %v2351_v45 = vmul.f32 %v2760_v15, %v2269_v54  ;;  %v2388_v31 = vadd.f32 %v2387_v43, %v2386_v8  ;;  %v1855_v43 = vrot.slane %v1854_v58, 1  ;;  %v1926_v30 = vsel %vm306_vm4, %v4112_v39, %v1925_v44 }
 0x7e4   :  { %v2374_v26 = vadd.f32 %v2373_v22, %v2372_v21  ;;  %v1864_v38 = vsel %vm233_vm1, %v1758_v20, 0.0  ;;  %v2405_v62 = vsel %vm233_vm1, %v2353_v49, 0.0  ;;  %v2416_v21 = vadd.f32 %v2415_v6, %v2414_v9 }
 0x7e5   :  { %v1865_v10 = vrot.slane %v1864_v38, 4  ;;  %v2391_v56 = vsel %vm233_vm1, %v2351_v45, 0.0  ;;  %v2406_v0 = vrot.slane %v2405_v62, 4  ;;  %v2389_v42 = vrot.slane %v2388_v31, 1 }
 0x7e6   :  { %v2375_v29 = vrot.slane %v2374_v26, 1  ;;  %v2392_v32 = vrot.slane %v2391_v56, 4  ;;  %v2417_v13 = vrot.slane %v2416_v21, 1  ;;  %v2404_v41 = vadd.f32 %v2403_v51, %v2402_v59 }
 0x7e7   :  { %v1866_v61 = vadd.f32 %v1865_v10, %v1864_v38  ;;  %v2407_v3 = vadd.f32 %v2406_v0, %v2405_v62  ;;  %v2390_v15 = vadd.f32 %v2389_v42, %v2388_v31  ;;  %v2438_v62 = vrot.slane %v2437_v35, 1 }
 0x7e8   :  { %v2376_v60 = vadd.f32 %v2375_v29, %v2374_v26  ;;  %v2393_v33 = vadd.f32 %v2392_v32, %v2391_v56 }
 0x7e9   :  { %v2332_v19 = vpop.permute.xlu1 %2331  ;;  %v2408_v12 = vrot.slane %v2407_v3, 2  ;;  %v1867_v53 = vrot.slane %v1866_v61, 2 }
 0x7ea   :  { %v2486_v27 = vsel %vm302_vm2, %v2376_v60, %v2369_v16  ;;  %v2394_v4 = vrot.slane %v2393_v33, 2  ;;  %v1735_v2 = vpop.permute.xlu0 %1734  ;;  %v2360_v25 = vmul.f32 %v4094_v14, %v2332_v19  ;;  %v2425_v14 = vadd.f32 %v2424_v57, %v4120_v46  ;;  %v2514_v19 = vpop.f32.mrf.mxu2 }
 0x7eb   :  { %v1757_v8 = vmul.f32 %v4123_v23, %v1735_v2  ;;  %v2409_v55 = vadd.f32 %v2408_v12, %v2407_v3  ;;  %v2487_v52 = vsel %vm304_vm3, %v2383_v18, %v2486_v27  ;;  %v1868_v45 = vadd.f32 %v1867_v53, %v1866_v61  ;;  %v2594_v3 = vld [vmem:[#allocation7 + $0x18] sm:$0xff] }
 0x7ec   :  { %v2395_v34 = vadd.f32 %v2394_v4, %v2393_v33  ;;  %v2454_v20 = vsel %vm233_vm1, %v2360_v25, 0.0  ;;  %v2488_v10 = vsel %vm306_vm4, %v2390_v15, %v2487_v52  ;;  %v2418_v57 = vadd.f32 %v2417_v13, %v2416_v21  ;;  %2618 = vmatpush.msra.mxu3 %v2594_v3 }
 0x7ed   :  { %v1857_v22 = vsel %vm233_vm1, %v1757_v8, 0.0  ;;  %v2410_v49 = vrot.slane %v2409_v55, 1  ;;  %v2455_v9 = vrot.slane %v2454_v20, 4  ;;  %v1856_v60 = vadd.f32 %v1855_v43, %v1854_v58  ;;  %v2592_v58 = vld [vmem:[#allocation7 + $0x8] sm:$0xff] }
 0x7ee   :  { %v2396_v54 = vrot.slane %v2395_v34, 1  ;;  %v1858_v5 = vrot.slane %v1857_v22, 4  ;;  %v1869_v61 = vrot.slane %v1868_v45, 1  ;;  %v2439_v12 = vadd.f32 %v2438_v62, %v2437_v35  ;;  %2619 = vmatpush.msra.mxu3 %v2593_v28 }
 0x7ef   :  { %v2456_v38 = vadd.f32 %v2455_v9, %v2454_v20  ;;  %v2411_v24 = vadd.f32 %v2410_v49, %v2409_v55  ;;  %v2445_v21 = vrot.slane %v4098_v47, 1  ;;  %v2528_v8 = vsel %vm302_vm2, %v4114_v7, %v2425_v14 }
 0x7f0   :  { %v2397_v50 = vadd.f32 %v2396_v54, %v2395_v34  ;;  %v1859_v26 = vadd.f32 %v1858_v5, %v1857_v22  ;;  %v1927_v25 = vsel %vm308_vm5, %v4118_v37, %v1926_v30  ;;  %v1870_v34 = vadd.f32 %v1869_v61, %v1868_v45  ;;  %2620 = vmatpush.msra.mxu3 %v2592_v58 }
 0x7f1   :  { %v2346_v56 = vpop.permute.xlu1 %2345  ;;  %v2457_v46 = vrot.slane %v2456_v38, 2  ;;  %v1928_v35 = vsel %vm310_vm6, %v1856_v60, %v1927_v25  ;;  %v2452_v52 = vrot.slane %v4116_v48, 1  ;;  %v2529_v22 = vsel %vm304_vm3, %v2439_v12, %v2528_v8 }
 0x7f2   :  { %v2489_v29 = vsel %vm308_vm5, %v2397_v50, %v2488_v10  ;;  %v1860_v32 = vrot.slane %v1859_v26, 2  ;;  %v2339_v0 = vpop.permute.xlu0 %2338  ;;  %v2362_v31 = vmul.f32 %v4104_v1, %v2346_v56  ;;  %v2446_v54 = vadd.f32 %v2445_v21, %v4098_v47  ;;  %v2591_v56 = vld [vmem:[#allocation7] sm:$0xff] }
 0x7f3   :  { %v2490_v16 = vsel %vm310_vm6, %v2404_v41, %v2489_v29  ;;  %v2361_v6 = vmul.f32 %v4123_v23, %v2339_v0  ;;  %v2458_v18 = vadd.f32 %v2457_v46, %v2456_v38  ;;  %v2453_v15 = vadd.f32 %v2452_v52, %v4116_v48  ;;  %v2556_v41 = vpop.f32.mrf.mxu0  ;;  %2621 = vmatpush.msra.mxu3 %v2591_v56  ;;  %v2562_v48 = vpop.permute.xlu2 %2561 }
 0x7f4   :  { %v2491_v39 = vsel %vm312_vm7, %v2411_v24, %v2490_v16  ;;  %v1861_v33 = vadd.f32 %v1860_v32, %v1859_v26  ;;  %v2468_v4 = vsel %vm233_vm1, %v2362_v31, 0.0  ;;  %v2530_v14 = vsel %vm306_vm4, %v2446_v54, %v2529_v22 }
 0x7f5   :  { %v2492_v59 = vsel %vm314_vm8, %v2418_v57, %v2491_v39  ;;  %v2461_v27 = vsel %vm233_vm1, %v2361_v6, 0.0  ;;  %v2469_v42 = vrot.slane %v2468_v4, 4  ;;  %v2459_v55 = vrot.slane %v2458_v18, 1  ;;  %v2720_v39 = vld [vmem:[%s4197_s4] ss:$0 sm:$0xff] }
 0x7f6   :  { %v2515_v23 = vadd.f32 %v2514_v19, %v2492_v59  ;;  %v1862_v2 = vrot.slane %v1861_v33, 1  ;;  %v2462_v1 = vrot.slane %v2461_v27, 4  ;;  %v2531_v26 = vsel %vm308_vm5, %v2453_v15, %v2530_v14 }
 0x7f7   :  { %v2470_v51 = vadd.f32 %v2469_v42, %v2468_v4  ;;  %v2460_v43 = vadd.f32 %v2459_v55, %v2458_v18  ;;  %v695_v24 = vadd.f32 %v3591_v36, %v3904_v40  ;;  %v737_v6 = vadd.f32 %v3797_v11, %v3920_v63 }
 0x7f8   :  { %v1863_v44 = vadd.f32 %v1862_v2, %v1861_v33  ;;  %v2463_v53 = vadd.f32 %v2462_v1, %v2461_v27  ;;  %2577 = vrot.lane.b32.xlu1 %v2515_v23, %s2929_s12 }
 0x7f9   :  { %v2471_v37 = vrot.slane %v2470_v51, 2  ;;  %v2532_v47 = vsel %vm310_vm6, %v2460_v43, %v2531_v26  ;;  %v2583_v32 = vsel %vm233_vm1, %v695_v24, %v2562_v48 }
 0x7fa   :  { %v2464_v20 = vrot.slane %v2463_v53, 2  ;;  %v1929_v7 = vsel %vm312_vm7, %v1863_v44, %v1928_v35 }
 0x7fb   :  { %v1930_v49 = vsel %vm314_vm8, %v1870_v34, %v1929_v7  ;;  %v2472_v13 = vadd.f32 %v2471_v37, %v2470_v51  ;;  %v2564_v16 = vpop.permute.xlu2 %2563 }
 0x7fc   :  { %v2465_v5 = vadd.f32 %v2464_v20, %v2463_v53  ;;  %v1953_v9 = vadd.f32 %v4136_v17, %v1930_v49  ;;  %v2584_v60 = vsel %vm233_vm1, %v737_v6, %v2564_v16 }
 0x7fd   :  { %v2473_v50 = vrot.slane %v2472_v13, 1 }
 0x7fe   :  { %v2466_v45 = vrot.slane %v2465_v5, 1  ;;  %2571 = vrot.lane.b32.xlu0 %v1953_v9, %s2920_s6 }
 0x7ff   :  { %v2474_v62 = vadd.f32 %v2473_v50, %v2472_v13 }
 0x800   :  { %v2467_v38 = vadd.f32 %v2466_v45, %v2465_v5 }
 0x802   :  { %v2533_v30 = vsel %vm312_vm7, %v2467_v38, %v2532_v47 }
 0x803   :  { %v2534_v17 = vsel %vm314_vm8, %v2474_v62, %v2533_v30 }
 0x804   :  { %v2557_v10 = vadd.f32 %v2556_v41, %v2534_v17 }
 0x806   :  { %2579 = vrot.lane.b32.xlu1 %v2557_v10, %s2929_s12 }
 0x813   :  { %v2570_v29 = vpop.permute.xlu0 %2569 }
 0x814   :  { %v2586_v46 = vsel %vm2585_vm9, %v2583_v32, %v2570_v29 }
 0x86a   :  { %v2578_v0 = vpop.permute.xlu1 %2577 }
 0x86b   :  { %v2589_v57 = vsel %vm2588_vm10, %v2586_v46, %v2578_v0 }
 0x86c   :  { %2678 = vmatmul.msk.f32.vlgmr.msra.gmra.mxu3 %vm2599_vm11, %v2589_v57 }
 0x870   :  { %v2572_v31 = vpop.permute.xlu0 %2571 }
 0x871   :  { %v2587_v61 = vsel %vm2585_vm9, %v2584_v60, %v2572_v31 }
 0x878   :  { %v2580_v36 = vpop.permute.xlu1 %2579 }
 0x879   :  { %v2590_v40 = vsel %vm2588_vm10, %v2587_v61, %v2580_v36 }
 0x87a   :  { %2679 = vmatmul.msk.f32.gmra.mxu3 %vm2599_vm11, %v2590_v40 }
 0x8ef   :  { %v2623_v33 = vpop.f32.mrf.mxu3 }
 0x8f0   :  { %v2624_v3 = vadd.f32 %v2720_v39, %v2623_v33 }
 0x8f2   :  { %2629 = vst.msk [vmem:[#allocation11] sm:$0xff] %vm2599_vm11, %v2624_v3 }
 0x8fd   :  { %v2626_v11 = vpop.f32.mrf.mxu3 }
 0x8fe   :  { %v2627_v63 = vadd.f32 %v2720_v39, %v2626_v11 }
 0x900   :  { %2630 = vst.msk [vmem:[#allocation11 + $0x8] sm:$0xff] %vm2599_vm11, %v2627_v63 }
 0x901   :  { %2643 = dma.vmem_to_hbm [thread:$0]  %s2636_s17, 256, %s2638_s0, [#allocation4], %s2914_s9, %s2914_s9, %s2915_s10  }
 0x902   :  { %2911 = dma.done.wait [#allocation4], 256  }
 0x903   :  { %2912 = vsyncadd [#allocation4], 4294967040 }
 0x904   :  { %2648 = vsyncpa [#allocation3], 1 }
 0x905   :  { %2649 = vsyncpa [#allocation6], 1 }
 0x906   :  { %2650 = vsyncpa [#allocation9], 1 }
 0x907   :  { %2651 = vsyncpa [#allocation4], 1 }

</bundles_post_ra>
